<compile_context>
chip_gen: v6e
topology: v6e:2x2x1
jax: 0.10.0
libtpu: 0.0.40
codegen_flags: <defaults>
</compile_context>

<pallas_src>
import functools

import jax
import jax.numpy as jnp
from jax import lax
from jax.experimental import pallas as pl
from jax.experimental.pallas import tpu as pltpu


def _round_up(a, b):
    return -(-a // b) * b


def _fused_two_conv_kernel(xp_ref, w1_ref, b1_ref, w2_ref, b2_ref, mask_ref,
                           o_ref, mid_ref, p1_ref, p2_ref,
                           *, nb, Wp, C1, C2, C3, Lp, lead, Sp_mid):
    """Processes `nb` images per grid step.

    xp_ref  : (nb, C1, Sp_x) f32   zero-padded input, flattened over (Hp, Wp),
                                   lane-padded so tap reads stay in bounds
    w1_ref  : (C2, 9*C1)     f32   conv1 weights, K ordered tap-major/chan-minor
    b1_ref  : (C2, 1)        f32   conv1 bias with the "-1" folded in
    w2_ref  : (C3, 9*C2)     bf16  conv2 weights
    b2_ref  : (C3, 1)        f32   conv2 bias with the "-2" folded in
    mask_ref: (1, Lp)        f32   1.0 on valid output columns, else 0.0
    o_ref   : (nb, C3, Lp)   f32   output on the (H, Wp) grid (wrapper crops)
    mid_ref : (nb, C2, Sp_mid) bf16  re-padded conv1 activation (interior at
                                     lane offset `lead`, a multiple of 128)
    p1_ref  : (9*C1, nb*Lp)  f32   conv1 im2col patch (lanes batched over images)
    p2_ref  : (9*C2, nb*Lp)  bf16  conv2 im2col patch
    """
    f32, bf16 = jnp.float32, jnp.bfloat16

    # Zero only the border/tail columns of `mid`; the interior [lead, lead+Lp)
    # is fully overwritten for every image below (avoids a full memset).
    mid_ref[:, :, :lead] = jnp.zeros((nb, C2, lead), bf16)
    mid_ref[:, :, lead + Lp:] = jnp.zeros((nb, C2, Sp_mid - lead - Lp), bf16)

    w1 = w1_ref[...]
    w2 = w2_ref[...]
    b1 = b1_ref[...]
    b2 = b2_ref[...]
    mask = mask_ref[...]

    # ---- conv1: build batched im2col patch (K = 9*C1), one MXU pass ----------
    for m in range(nb):
        for t in range(9):
            off = (t // 3) * Wp + (t % 3)
            p1_ref[t * C1:(t + 1) * C1, m * Lp:(m + 1) * Lp] = (
                xp_ref[m, :, off:off + Lp])
    acc1 = jnp.dot(w1, p1_ref[...], preferred_element_type=f32)   # (C2, nb*Lp)

    # bias (sub folded), ReLU, zero invalid columns, re-pad into mid (bf16).
    # Interior store starts at lane offset `lead` (multiple of 128) -> unmasked.
    for m in range(nb):
        h = jnp.maximum(acc1[:, m * Lp:(m + 1) * Lp] + b1, 0.0) * mask
        mid_ref[m, :, lead:lead + Lp] = h.astype(bf16)

    # ---- conv2: batched im2col patch (K = 9*C2), one bf16 MXU pass -----------
    base = lead - (Wp + 1)      # padded-grid index 0 sits at buffer column base
    for m in range(nb):
        for t in range(9):
            off = base + (t // 3) * Wp + (t % 3)
            p2_ref[t * C2:(t + 1) * C2, m * Lp:(m + 1) * Lp] = (
                mid_ref[m, :, off:off + Lp])
    acc2 = jnp.dot(w2, p2_ref[...], preferred_element_type=f32)   # (C3, nb*Lp)

    for m in range(nb):
        o_ref[m] = jnp.maximum(acc2[:, m * Lp:(m + 1) * Lp] + b2, 0.0)


def model_forward(x_nchw, params):
    """Reproduces the PyTorch Model.forward. Input/output in NCHW (float32)."""
    w1, b1, w2, b2 = params                       # weights in HWIO
    N, C1, H, W = x_nchw.shape
    C2 = w1.shape[-1]
    C3 = w2.shape[-1]
    Hp, Wp = H + 2, W + 2
    S = Hp * Wp                                   # padded image, flattened
    L = H * Wp                                    # output rows on (H, Wp) grid
    Lp = _round_up(L, 128)                        # lane-dense output width
    pad_blk = _round_up(Wp + 1, 128)
    lead = pad_blk                                # interior offset inside mid
    Sp_mid = lead + Lp + pad_blk                  # covers max tap read + border
    Sp_x = _round_up(max(S, Lp + 2 * Wp + 2), 128)  # covers max conv1 tap read

    # ---- per-step image batch (amortize grid-step overhead, keep >=2 steps) --
    if N >= 16:
        nb = 8
    elif N >= 2:
        nb = N // 2
    else:
        nb = 1
    # crude VMEM guard: keep the conv2 patch under ~6 MiB
    nb = min(nb, max(1, (6 * 1024 * 1024) // (9 * C2 * Lp * 2)))
    G = -(-N // nb)
    Np = G * nb

    # zero-pad: batch -> Np, spatial -> (Hp, Wp), flatten, lane-pad -> Sp_x
    xpad = jnp.pad(x_nchw, ((0, Np - N), (0, 0), (1, 1), (1, 1)))
    xp_flat = jnp.pad(xpad.reshape(Np, C1, S), ((0, 0), (0, 0), (0, Sp_x - S)))

    # weights as (Cout, 9*Cin), K ordered tap-major / channel-minor; biases with
    # the subtract constants folded in.
    w1t = w1.reshape(9 * C1, C2).T.astype(jnp.float32)
    w2t = w2.reshape(9 * C2, C3).T.astype(jnp.bfloat16)
    b1m = (b1 - 1.0).reshape(C2, 1).astype(jnp.float32)
    b2m = (b2 - 2.0).reshape(C3, 1).astype(jnp.float32)

    # valid-column mask on the lane-padded (H, Wp) output grid
    q = jnp.arange(Lp, dtype=jnp.int32)
    mask = ((q % Wp < W) & (q < L)).astype(jnp.float32).reshape(1, Lp)

    kernel = functools.partial(_fused_two_conv_kernel,
                               nb=nb, Wp=Wp, C1=C1, C2=C2, C3=C3,
                               Lp=Lp, lead=lead, Sp_mid=Sp_mid)

    out = pl.pallas_call(
        kernel,
        out_shape=jax.ShapeDtypeStruct((Np, C3, Lp), jnp.float32),
        grid_spec=pltpu.PrefetchScalarGridSpec(
            num_scalar_prefetch=0,
            grid=(G,),
            in_specs=[
                pl.BlockSpec((nb, C1, Sp_x), lambda g: (g, 0, 0)),
                pl.BlockSpec((C2, 9 * C1), lambda g: (0, 0)),
                pl.BlockSpec((C2, 1), lambda g: (0, 0)),
                pl.BlockSpec((C3, 9 * C2), lambda g: (0, 0)),
                pl.BlockSpec((C3, 1), lambda g: (0, 0)),
                pl.BlockSpec((1, Lp), lambda g: (0, 0)),
            ],
            out_specs=pl.BlockSpec((nb, C3, Lp), lambda g: (g, 0, 0)),
            scratch_shapes=[
                pltpu.VMEM((nb, C2, Sp_mid), jnp.bfloat16),   # mid
                pltpu.VMEM((9 * C1, nb * Lp), jnp.float32),   # conv1 patch
                pltpu.VMEM((9 * C2, nb * Lp), jnp.bfloat16),  # conv2 patch
            ],
        ),
        compiler_params=pltpu.CompilerParams(
            dimension_semantics=("parallel",)),
    )(xp_flat, w1t, b1m, w2t, b2m, mask)

    # drop padded batch entries and garbage columns -> NCHW, no transposes
    return out[:N, :, :L].reshape(N, C3, H, Wp)[:, :, :, :W]


def init_params(key):
    """Deterministic init (uniform, PyTorch-like fan_in bounds), HWIO weights."""
    k1, k2, k3, k4 = jax.random.split(key, 4)
    c_in1, c_out1, c_in2, c_out2, k = 3, 32, 32, 16, 3
    bound1 = 1.0 / (c_in1 * k * k) ** 0.5
    bound2 = 1.0 / (c_in2 * k * k) ** 0.5
    w1 = jax.random.uniform(k1, (k, k, c_in1, c_out1), jnp.float32, -bound1, bound1)
    b1 = jax.random.uniform(k2, (c_out1,), jnp.float32, -bound1, bound1)
    w2 = jax.random.uniform(k3, (k, k, c_in2, c_out2), jnp.float32, -bound2, bound2)
    b2 = jax.random.uniform(k4, (c_out2,), jnp.float32, -bound2, bound2)
    return w1, b1, w2, b2


def _reference_forward(x_nchw, params):
    """Pure-JAX reference (lax.conv, f32) for validation."""
    w1, b1, w2, b2 = params
    dn = lax.conv_dimension_numbers(x_nchw.shape, w1.shape, ("NCHW", "HWIO", "NCHW"))
    v1 = lax.conv_general_dilated(x_nchw, w1, (1, 1), "SAME", dimension_numbers=dn)
    v1 = v1 + b1[None, :, None, None]
    v3 = jnp.maximum(v1 - 1.0, 0.0)
    dn2 = lax.conv_dimension_numbers(v3.shape, w2.shape, ("NCHW", "HWIO", "NCHW"))
    v4 = lax.conv_general_dilated(v3, w2, (1, 1), "SAME", dimension_numbers=dn2)
    v4 = v4 + b2[None, :, None, None]
    return jnp.maximum(v4 - 2.0, 0.0)


if __name__ == "__main__":
    key = jax.random.PRNGKey(0)
    kx, kp = jax.random.split(key)
    # Small shape consistent with the module's forward (NCHW, 3 input channels).
    x = jax.random.normal(kx, (2, 3, 16, 16), dtype=jnp.float32)
    params = init_params(kp)

    fwd = jax.jit(model_forward)
    out = jax.block_until_ready(fwd(x, params))

    ref = _reference_forward(x, params)
    assert out.shape == (2, 16, 16, 16), out.shape
    # conv2 runs with bf16 MXU operands (f32 accumulation) -> loosened tolerance
    err = float(jnp.max(jnp.abs(out - ref)))
    assert err < 3e-2, f"max abs err {err}"
    print("KERNEL_OK")
</pallas_src>

<mosaic_0001>
module attributes {stable_mosaic.version = 11 : i64} {
  func.func @_fused_two_conv_kernel(%arg0: i32, %arg1: memref<1x3x512xf32, #tpu.memory_space<vmem>>, %arg2: memref<32x27xf32, #tpu.memory_space<vmem>>, %arg3: memref<32x1xf32, #tpu.memory_space<vmem>>, %arg4: memref<16x288xbf16, #tpu.memory_space<vmem>>, %arg5: memref<16x1xf32, #tpu.memory_space<vmem>>, %arg6: memref<1x384xf32, #tpu.memory_space<vmem>>, %arg7: memref<1x16x384xf32, #tpu.memory_space<vmem>>, %arg8: memref<1x32x640xbf16, #tpu.memory_space<vmem>>, %arg9: memref<27x384xf32, #tpu.memory_space<vmem>>, %arg10: memref<288x384xbf16, #tpu.memory_space<vmem>>) attributes {dimension_semantics = [#tpu.dimension_semantics<parallel>], iteration_bounds = array<i64: 2>, scalar_prefetch = 0 : i64, scratch_operands = 3 : i64, tpu.core_type = #tpu.core_type<tc>, window_params = [{transform_indices = @transform_0, window_bounds = array<i64: 1, 3, 512>}, {pipeline_mode = #tpu.pipeline_mode<synchronous>, transform_indices = @transform_1, window_bounds = array<i64: 32, 27>}, {pipeline_mode = #tpu.pipeline_mode<synchronous>, transform_indices = @transform_2, window_bounds = array<i64: 32, 1>}, {pipeline_mode = #tpu.pipeline_mode<synchronous>, transform_indices = @transform_3, window_bounds = array<i64: 16, 288>}, {pipeline_mode = #tpu.pipeline_mode<synchronous>, transform_indices = @transform_4, window_bounds = array<i64: 16, 1>}, {pipeline_mode = #tpu.pipeline_mode<synchronous>, transform_indices = @transform_5, window_bounds = array<i64: 1, 384>}, {transform_indices = @transform_6, window_bounds = array<i64: 1, 16, 384>}]} {
    %cst = arith.constant 0.000000e+00 : bf16
    %0 = vector.broadcast %cst : bf16 to vector<1x32x128xbf16>
    %c0 = arith.constant 0 : index
    %c0_0 = arith.constant 0 : index
    %c0_1 = arith.constant 0 : index
    %1 = vector.load %arg8[%c0, %c0_0, %c0_1] : memref<1x32x640xbf16, #tpu.memory_space<vmem>>, vector<1x32x128xbf16>
    tpu.vector_store %arg8[%c0, %c0_0, %c0_1], %0 {strides = array<i32>} : memref<1x32x640xbf16, #tpu.memory_space<vmem>>, vector<1x32x128xbf16>,
    %cst_2 = arith.constant 0.000000e+00 : bf16
    %2 = vector.broadcast %cst_2 : bf16 to vector<1x32x128xbf16>
    %c0_3 = arith.constant 0 : index
    %c0_4 = arith.constant 0 : index
    %c512 = arith.constant 512 : index
    %3 = vector.load %arg8[%c0_3, %c0_4, %c512] : memref<1x32x640xbf16, #tpu.memory_space<vmem>>, vector<1x32x128xbf16>
    tpu.vector_store %arg8[%c0_3, %c0_4, %c512], %2 {strides = array<i32>} : memref<1x32x640xbf16, #tpu.memory_space<vmem>>, vector<1x32x128xbf16>,
    %c0_5 = arith.constant 0 : index
    %c0_6 = arith.constant 0 : index
    %4 = vector.load %arg2[%c0_5, %c0_6] : memref<32x27xf32, #tpu.memory_space<vmem>>, vector<32x27xf32>
    %c0_7 = arith.constant 0 : index
    %c0_8 = arith.constant 0 : index
    %5 = vector.load %arg4[%c0_7, %c0_8] : memref<16x288xbf16, #tpu.memory_space<vmem>>, vector<16x288xbf16>
    %c0_9 = arith.constant 0 : index
    %c0_10 = arith.constant 0 : index
    %6 = vector.load %arg3[%c0_9, %c0_10] : memref<32x1xf32, #tpu.memory_space<vmem>>, vector<32x1xf32>
    %c0_11 = arith.constant 0 : index
    %c0_12 = arith.constant 0 : index
    %7 = vector.load %arg5[%c0_11, %c0_12] : memref<16x1xf32, #tpu.memory_space<vmem>>, vector<16x1xf32>
    %c0_13 = arith.constant 0 : index
    %c0_14 = arith.constant 0 : index
    %8 = vector.load %arg6[%c0_13, %c0_14] : memref<1x384xf32, #tpu.memory_space<vmem>>, vector<1x384xf32>
    %c0_15 = arith.constant 0 : index
    %c0_16 = arith.constant 0 : index
    %c0_17 = arith.constant 0 : index
    %9 = vector.load %arg1[%c0_15, %c0_16, %c0_17] : memref<1x3x512xf32, #tpu.memory_space<vmem>>, vector<1x3x384xf32>
    %10 = vector.shape_cast %9 : vector<1x3x384xf32> to vector<3x384xf32>
    %c0_18 = arith.constant 0 : index
    %c0_19 = arith.constant 0 : index
    %11 = vector.load %arg9[%c0_18, %c0_19] : memref<27x384xf32, #tpu.memory_space<vmem>>, vector<3x384xf32>
    tpu.vector_store %arg9[%c0_18, %c0_19], %10 {strides = array<i32>} : memref<27x384xf32, #tpu.memory_space<vmem>>, vector<3x384xf32>,
    %c0_20 = arith.constant 0 : index
    %c0_21 = arith.constant 0 : index
    %c1 = arith.constant 1 : index
    %12 = vector.load %arg1[%c0_20, %c0_21, %c1] : memref<1x3x512xf32, #tpu.memory_space<vmem>>, vector<1x3x384xf32>
    %13 = vector.shape_cast %12 : vector<1x3x384xf32> to vector<3x384xf32>
    %c3 = arith.constant 3 : index
    %c0_22 = arith.constant 0 : index
    %14 = vector.load %arg9[%c3, %c0_22] : memref<27x384xf32, #tpu.memory_space<vmem>>, vector<3x384xf32>
    tpu.vector_store %arg9[%c3, %c0_22], %13 {strides = array<i32>} : memref<27x384xf32, #tpu.memory_space<vmem>>, vector<3x384xf32>,
    %c0_23 = arith.constant 0 : index
    %c0_24 = arith.constant 0 : index
    %c2 = arith.constant 2 : index
    %15 = vector.load %arg1[%c0_23, %c0_24, %c2] : memref<1x3x512xf32, #tpu.memory_space<vmem>>, vector<1x3x384xf32>
    %16 = vector.shape_cast %15 : vector<1x3x384xf32> to vector<3x384xf32>
    %c6 = arith.constant 6 : index
    %c0_25 = arith.constant 0 : index
    %17 = vector.load %arg9[%c6, %c0_25] : memref<27x384xf32, #tpu.memory_space<vmem>>, vector<3x384xf32>
    tpu.vector_store %arg9[%c6, %c0_25], %16 {strides = array<i32>} : memref<27x384xf32, #tpu.memory_space<vmem>>, vector<3x384xf32>,
    %c0_26 = arith.constant 0 : index
    %c0_27 = arith.constant 0 : index
    %c18 = arith.constant 18 : index
    %18 = vector.load %arg1[%c0_26, %c0_27, %c18] : memref<1x3x512xf32, #tpu.memory_space<vmem>>, vector<1x3x384xf32>
    %19 = vector.shape_cast %18 : vector<1x3x384xf32> to vector<3x384xf32>
    %c9 = arith.constant 9 : index
    %c0_28 = arith.constant 0 : index
    %20 = vector.load %arg9[%c9, %c0_28] : memref<27x384xf32, #tpu.memory_space<vmem>>, vector<3x384xf32>
    tpu.vector_store %arg9[%c9, %c0_28], %19 {strides = array<i32>} : memref<27x384xf32, #tpu.memory_space<vmem>>, vector<3x384xf32>,
    %c0_29 = arith.constant 0 : index
    %c0_30 = arith.constant 0 : index
    %c19 = arith.constant 19 : index
    %21 = vector.load %arg1[%c0_29, %c0_30, %c19] : memref<1x3x512xf32, #tpu.memory_space<vmem>>, vector<1x3x384xf32>
    %22 = vector.shape_cast %21 : vector<1x3x384xf32> to vector<3x384xf32>
    %c12 = arith.constant 12 : index
    %c0_31 = arith.constant 0 : index
    %23 = vector.load %arg9[%c12, %c0_31] : memref<27x384xf32, #tpu.memory_space<vmem>>, vector<3x384xf32>
    tpu.vector_store %arg9[%c12, %c0_31], %22 {strides = array<i32>} : memref<27x384xf32, #tpu.memory_space<vmem>>, vector<3x384xf32>,
    %c0_32 = arith.constant 0 : index
    %c0_33 = arith.constant 0 : index
    %c20 = arith.constant 20 : index
    %24 = vector.load %arg1[%c0_32, %c0_33, %c20] : memref<1x3x512xf32, #tpu.memory_space<vmem>>, vector<1x3x384xf32>
    %25 = vector.shape_cast %24 : vector<1x3x384xf32> to vector<3x384xf32>
    %c15 = arith.constant 15 : index
    %c0_34 = arith.constant 0 : index
    %26 = vector.load %arg9[%c15, %c0_34] : memref<27x384xf32, #tpu.memory_space<vmem>>, vector<3x384xf32>
    tpu.vector_store %arg9[%c15, %c0_34], %25 {strides = array<i32>} : memref<27x384xf32, #tpu.memory_space<vmem>>, vector<3x384xf32>,
    %c0_35 = arith.constant 0 : index
    %c0_36 = arith.constant 0 : index
    %c36 = arith.constant 36 : index
    %27 = vector.load %arg1[%c0_35, %c0_36, %c36] : memref<1x3x512xf32, #tpu.memory_space<vmem>>, vector<1x3x384xf32>
    %28 = vector.shape_cast %27 : vector<1x3x384xf32> to vector<3x384xf32>
    %c18_37 = arith.constant 18 : index
    %c0_38 = arith.constant 0 : index
    %29 = vector.load %arg9[%c18_37, %c0_38] : memref<27x384xf32, #tpu.memory_space<vmem>>, vector<3x384xf32>
    tpu.vector_store %arg9[%c18_37, %c0_38], %28 {strides = array<i32>} : memref<27x384xf32, #tpu.memory_space<vmem>>, vector<3x384xf32>,
    %c0_39 = arith.constant 0 : index
    %c0_40 = arith.constant 0 : index
    %c37 = arith.constant 37 : index
    %30 = vector.load %arg1[%c0_39, %c0_40, %c37] : memref<1x3x512xf32, #tpu.memory_space<vmem>>, vector<1x3x384xf32>
    %31 = vector.shape_cast %30 : vector<1x3x384xf32> to vector<3x384xf32>
    %c21 = arith.constant 21 : index
    %c0_41 = arith.constant 0 : index
    %32 = vector.load %arg9[%c21, %c0_41] : memref<27x384xf32, #tpu.memory_space<vmem>>, vector<3x384xf32>
    tpu.vector_store %arg9[%c21, %c0_41], %31 {strides = array<i32>} : memref<27x384xf32, #tpu.memory_space<vmem>>, vector<3x384xf32>,
    %c0_42 = arith.constant 0 : index
    %c0_43 = arith.constant 0 : index
    %c38 = arith.constant 38 : index
    %33 = vector.load %arg1[%c0_42, %c0_43, %c38] : memref<1x3x512xf32, #tpu.memory_space<vmem>>, vector<1x3x384xf32>
    %34 = vector.shape_cast %33 : vector<1x3x384xf32> to vector<3x384xf32>
    %c24 = arith.constant 24 : index
    %c0_44 = arith.constant 0 : index
    %35 = vector.load %arg9[%c24, %c0_44] : memref<27x384xf32, #tpu.memory_space<vmem>>, vector<3x384xf32>
    tpu.vector_store %arg9[%c24, %c0_44], %34 {strides = array<i32>} : memref<27x384xf32, #tpu.memory_space<vmem>>, vector<3x384xf32>,
    %c0_45 = arith.constant 0 : index
    %c0_46 = arith.constant 0 : index
    %36 = vector.load %arg9[%c0_45, %c0_46] : memref<27x384xf32, #tpu.memory_space<vmem>>, vector<27x384xf32>
    %cst_47 = arith.constant dense<0.000000e+00> : vector<32x384xf32>
    %37 = tpu.matmul %4, %36, %cst_47 {dimension_numbers = #tpu.dot_dimension_numbers<[1], [0], [0], [1], [0, 0, 1, 1], [], []>} : vector<32x27xf32>, vector<27x384xf32>, vector<32x384xf32> -> vector<32x384xf32>
    %38 = vector.broadcast %6 : vector<32x1xf32> to vector<32x384xf32>
    %39 = arith.addf %37, %38 : vector<32x384xf32>
    %cst_48 = arith.constant 0.000000e+00 : f32
    %40 = vector.broadcast %cst_48 : f32 to vector<32x384xf32>
    %41 = arith.maximumf %39, %40 : vector<32x384xf32>
    %42 = vector.broadcast %8 : vector<1x384xf32> to vector<32x384xf32>
    %43 = arith.mulf %41, %42 : vector<32x384xf32>
    %44 = arith.truncf %43 : vector<32x384xf32> to vector<32x384xbf16>
    %c0_49 = arith.constant 0 : index
    %c0_50 = arith.constant 0 : index
    %c128 = arith.constant 128 : index
    %45 = vector.load %arg8[%c0_49, %c0_50, %c128] : memref<1x32x640xbf16, #tpu.memory_space<vmem>>, vector<1x32x384xbf16>
    %46 = vector.shape_cast %45 : vector<1x32x384xbf16> to vector<32x384xbf16>
    %47 = vector.shape_cast %44 : vector<32x384xbf16> to vector<1x32x384xbf16>
    tpu.vector_store %arg8[%c0_49, %c0_50, %c128], %47 {strides = array<i32>} : memref<1x32x640xbf16, #tpu.memory_space<vmem>>, vector<1x32x384xbf16>,
    %c0_51 = arith.constant 0 : index
    %c0_52 = arith.constant 0 : index
    %c109 = arith.constant 109 : index
    %48 = vector.load %arg8[%c0_51, %c0_52, %c109] : memref<1x32x640xbf16, #tpu.memory_space<vmem>>, vector<1x32x384xbf16>
    %49 = vector.shape_cast %48 : vector<1x32x384xbf16> to vector<32x384xbf16>
    %c0_53 = arith.constant 0 : index
    %c0_54 = arith.constant 0 : index
    %50 = vector.load %arg10[%c0_53, %c0_54] : memref<288x384xbf16, #tpu.memory_space<vmem>>, vector<32x384xbf16>
    tpu.vector_store %arg10[%c0_53, %c0_54], %49 {strides = array<i32>} : memref<288x384xbf16, #tpu.memory_space<vmem>>, vector<32x384xbf16>,
    %c0_55 = arith.constant 0 : index
    %c0_56 = arith.constant 0 : index
    %c110 = arith.constant 110 : index
    %51 = vector.load %arg8[%c0_55, %c0_56, %c110] : memref<1x32x640xbf16, #tpu.memory_space<vmem>>, vector<1x32x384xbf16>
    %52 = vector.shape_cast %51 : vector<1x32x384xbf16> to vector<32x384xbf16>
    %c32 = arith.constant 32 : index
    %c0_57 = arith.constant 0 : index
    %53 = vector.load %arg10[%c32, %c0_57] : memref<288x384xbf16, #tpu.memory_space<vmem>>, vector<32x384xbf16>
    tpu.vector_store %arg10[%c32, %c0_57], %52 {strides = array<i32>} : memref<288x384xbf16, #tpu.memory_space<vmem>>, vector<32x384xbf16>,
    %c0_58 = arith.constant 0 : index
    %c0_59 = arith.constant 0 : index
    %c111 = arith.constant 111 : index
    %54 = vector.load %arg8[%c0_58, %c0_59, %c111] : memref<1x32x640xbf16, #tpu.memory_space<vmem>>, vector<1x32x384xbf16>
    %55 = vector.shape_cast %54 : vector<1x32x384xbf16> to vector<32x384xbf16>
    %c64 = arith.constant 64 : index
    %c0_60 = arith.constant 0 : index
    %56 = vector.load %arg10[%c64, %c0_60] : memref<288x384xbf16, #tpu.memory_space<vmem>>, vector<32x384xbf16>
    tpu.vector_store %arg10[%c64, %c0_60], %55 {strides = array<i32>} : memref<288x384xbf16, #tpu.memory_space<vmem>>, vector<32x384xbf16>,
    %c0_61 = arith.constant 0 : index
    %c0_62 = arith.constant 0 : index
    %c127 = arith.constant 127 : index
    %57 = vector.load %arg8[%c0_61, %c0_62, %c127] : memref<1x32x640xbf16, #tpu.memory_space<vmem>>, vector<1x32x384xbf16>
    %58 = vector.shape_cast %57 : vector<1x32x384xbf16> to vector<32x384xbf16>
    %c96 = arith.constant 96 : index
    %c0_63 = arith.constant 0 : index
    %59 = vector.load %arg10[%c96, %c0_63] : memref<288x384xbf16, #tpu.memory_space<vmem>>, vector<32x384xbf16>
    tpu.vector_store %arg10[%c96, %c0_63], %58 {strides = array<i32>} : memref<288x384xbf16, #tpu.memory_space<vmem>>, vector<32x384xbf16>,
    %c0_64 = arith.constant 0 : index
    %c0_65 = arith.constant 0 : index
    %c128_66 = arith.constant 128 : index
    %60 = vector.load %arg8[%c0_64, %c0_65, %c128_66] : memref<1x32x640xbf16, #tpu.memory_space<vmem>>, vector<1x32x384xbf16>
    %61 = vector.shape_cast %60 : vector<1x32x384xbf16> to vector<32x384xbf16>
    %c128_67 = arith.constant 128 : index
    %c0_68 = arith.constant 0 : index
    %62 = vector.load %arg10[%c128_67, %c0_68] : memref<288x384xbf16, #tpu.memory_space<vmem>>, vector<32x384xbf16>
    tpu.vector_store %arg10[%c128_67, %c0_68], %61 {strides = array<i32>} : memref<288x384xbf16, #tpu.memory_space<vmem>>, vector<32x384xbf16>,
    %c0_69 = arith.constant 0 : index
    %c0_70 = arith.constant 0 : index
    %c129 = arith.constant 129 : index
    %63 = vector.load %arg8[%c0_69, %c0_70, %c129] : memref<1x32x640xbf16, #tpu.memory_space<vmem>>, vector<1x32x384xbf16>
    %64 = vector.shape_cast %63 : vector<1x32x384xbf16> to vector<32x384xbf16>
    %c160 = arith.constant 160 : index
    %c0_71 = arith.constant 0 : index
    %65 = vector.load %arg10[%c160, %c0_71] : memref<288x384xbf16, #tpu.memory_space<vmem>>, vector<32x384xbf16>
    tpu.vector_store %arg10[%c160, %c0_71], %64 {strides = array<i32>} : memref<288x384xbf16, #tpu.memory_space<vmem>>, vector<32x384xbf16>,
    %c0_72 = arith.constant 0 : index
    %c0_73 = arith.constant 0 : index
    %c145 = arith.constant 145 : index
    %66 = vector.load %arg8[%c0_72, %c0_73, %c145] : memref<1x32x640xbf16, #tpu.memory_space<vmem>>, vector<1x32x384xbf16>
    %67 = vector.shape_cast %66 : vector<1x32x384xbf16> to vector<32x384xbf16>
    %c192 = arith.constant 192 : index
    %c0_74 = arith.constant 0 : index
    %68 = vector.load %arg10[%c192, %c0_74] : memref<288x384xbf16, #tpu.memory_space<vmem>>, vector<32x384xbf16>
    tpu.vector_store %arg10[%c192, %c0_74], %67 {strides = array<i32>} : memref<288x384xbf16, #tpu.memory_space<vmem>>, vector<32x384xbf16>,
    %c0_75 = arith.constant 0 : index
    %c0_76 = arith.constant 0 : index
    %c146 = arith.constant 146 : index
    %69 = vector.load %arg8[%c0_75, %c0_76, %c146] : memref<1x32x640xbf16, #tpu.memory_space<vmem>>, vector<1x32x384xbf16>
    %70 = vector.shape_cast %69 : vector<1x32x384xbf16> to vector<32x384xbf16>
    %c224 = arith.constant 224 : index
    %c0_77 = arith.constant 0 : index
    %71 = vector.load %arg10[%c224, %c0_77] : memref<288x384xbf16, #tpu.memory_space<vmem>>, vector<32x384xbf16>
    tpu.vector_store %arg10[%c224, %c0_77], %70 {strides = array<i32>} : memref<288x384xbf16, #tpu.memory_space<vmem>>, vector<32x384xbf16>,
    %c0_78 = arith.constant 0 : index
    %c0_79 = arith.constant 0 : index
    %c147 = arith.constant 147 : index
    %72 = vector.load %arg8[%c0_78, %c0_79, %c147] : memref<1x32x640xbf16, #tpu.memory_space<vmem>>, vector<1x32x384xbf16>
    %73 = vector.shape_cast %72 : vector<1x32x384xbf16> to vector<32x384xbf16>
    %c256 = arith.constant 256 : index
    %c0_80 = arith.constant 0 : index
    %74 = vector.load %arg10[%c256, %c0_80] : memref<288x384xbf16, #tpu.memory_space<vmem>>, vector<32x384xbf16>
    tpu.vector_store %arg10[%c256, %c0_80], %73 {strides = array<i32>} : memref<288x384xbf16, #tpu.memory_space<vmem>>, vector<32x384xbf16>,
    %c0_81 = arith.constant 0 : index
    %c0_82 = arith.constant 0 : index
    %75 = vector.load %arg10[%c0_81, %c0_82] : memref<288x384xbf16, #tpu.memory_space<vmem>>, vector<288x384xbf16>
    %cst_83 = arith.constant dense<0.000000e+00> : vector<16x384xf32>
    %76 = tpu.matmul %5, %75, %cst_83 {dimension_numbers = #tpu.dot_dimension_numbers<[1], [0], [0], [1], [0, 0, 1, 1], [], []>} : vector<16x288xbf16>, vector<288x384xbf16>, vector<16x384xf32> -> vector<16x384xf32>
    %77 = vector.broadcast %7 : vector<16x1xf32> to vector<16x384xf32>
    %78 = arith.addf %76, %77 : vector<16x384xf32>
    %cst_84 = arith.constant 0.000000e+00 : f32
    %79 = vector.broadcast %cst_84 : f32 to vector<16x384xf32>
    %80 = arith.maximumf %78, %79 : vector<16x384xf32>
    %c0_85 = arith.constant 0 : index
    %c0_86 = arith.constant 0 : index
    %c0_87 = arith.constant 0 : index
    %81 = vector.load %arg7[%c0_85, %c0_86, %c0_87] : memref<1x16x384xf32, #tpu.memory_space<vmem>>, vector<1x16x384xf32>
    %82 = vector.shape_cast %81 : vector<1x16x384xf32> to vector<16x384xf32>
    %83 = vector.shape_cast %80 : vector<16x384xf32> to vector<1x16x384xf32>
    tpu.vector_store %arg7[%c0_85, %c0_86, %c0_87], %83 {strides = array<i32>} : memref<1x16x384xf32, #tpu.memory_space<vmem>>, vector<1x16x384xf32>,
    return
  }
  func.func @transform_0(%arg0: i32) -> (i32, i32, i32) {
    %c0_i32 = arith.constant 0 : i32
    %c0_i32_0 = arith.constant 0 : i32
    %c0_i32_1 = arith.constant 0 : i32
    return %arg0, %c0_i32, %c0_i32_0 : i32, i32, i32
  }
  func.func @transform_1(%arg0: i32) -> (i32, i32) {
    %c0_i32 = arith.constant 0 : i32
    %c0_i32_0 = arith.constant 0 : i32
    %c0_i32_1 = arith.constant 0 : i32
    return %c0_i32, %c0_i32_0 : i32, i32
  }
  func.func @transform_2(%arg0: i32) -> (i32, i32) {
    %c0_i32 = arith.constant 0 : i32
    %c0_i32_0 = arith.constant 0 : i32
    %c0_i32_1 = arith.constant 0 : i32
    return %c0_i32, %c0_i32_0 : i32, i32
  }
  func.func @transform_3(%arg0: i32) -> (i32, i32) {
    %c0_i32 = arith.constant 0 : i32
    %c0_i32_0 = arith.constant 0 : i32
    %c0_i32_1 = arith.constant 0 : i32
    return %c0_i32, %c0_i32_0 : i32, i32
  }
  func.func @transform_4(%arg0: i32) -> (i32, i32) {
    %c0_i32 = arith.constant 0 : i32
    %c0_i32_0 = arith.constant 0 : i32
    %c0_i32_1 = arith.constant 0 : i32
    return %c0_i32, %c0_i32_0 : i32, i32
  }
  func.func @transform_5(%arg0: i32) -> (i32, i32) {
    %c0_i32 = arith.constant 0 : i32
    %c0_i32_0 = arith.constant 0 : i32
    %c0_i32_1 = arith.constant 0 : i32
    return %c0_i32, %c0_i32_0 : i32, i32
  }
  func.func @transform_6(%arg0: i32) -> (i32, i32, i32) {
    %c0_i32 = arith.constant 0 : i32
    %c0_i32_0 = arith.constant 0 : i32
    %c0_i32_1 = arith.constant 0 : i32
    return %arg0, %c0_i32, %c0_i32_0 : i32, i32, i32
  }
}

</mosaic_0001>

<bundles_post_ra>
// kernel: model_forward.1
= control target key start
LH: loop header
LB: loop body
LE: loop exit
PB: predicated region body
PF: predicated region fallthrough
CT: control target
= control target key end

     0   :  { %s2297_s21 = smov 0   ;;  %s2886_s0 = inlined_call_operand.vmem [shape: f32[2,3,512], index: 0, kind: input, shape index: {}]   ;;  %s2887_s1 = inlined_call_operand.vmem [shape: f32[32,27], index: 1, kind: input, shape index: {}]   ;;  %s2888_s2 = inlined_call_operand.vmem [shape: f32[32,1], index: 2, kind: input, shape index: {}]   ;;  %s2889_s3 = inlined_call_operand.vmem [shape: bf16[16,288], index: 3, kind: input, shape index: {}]   ;;  %s2890_s4 = inlined_call_operand.vmem [shape: f32[16,1], index: 4, kind: input, shape index: {}]   ;;  %s2891_s5 = inlined_call_operand.vmem [shape: f32[1,384], index: 5, kind: input, shape index: {}]   ;;  %s2892_s6 = inlined_call_operand.vmem [shape: f32[2,16,384], index: 6, kind: output, shape index: {}]  }
   0x1 LB: > { %s2016_s22 = sadd.s32 4294967295, %s2244_s21   ;;  %p2020_p0 = scmp.ge.s32.totalorder %s2244_s21, 1  ;;  %s2244_s21 = sphi %s2297_s21, %s16_s21  }
   0x2   : > { %p212_p1 = scmp.lt.s32.totalorder %s2244_s21, 3 }
   0x4   : > { %p213_p2 = pnand %p2020_p0, %p212_p1 }
   0x5   : > { %p242_p3 = scmp.lt.s32.totalorder (!%p213_p2), %s2016_s22, 1  ;;  %s2246_s27 = smov (!%p213_p2), 90  }
   0x6   : > { %216 = sbr.rel (%p213_p2) target bundleno = 877 (0x36d), region = 44  ;;  %s2247_s28 = smov (!%p213_p2), 108  }
   0x7   : > { %s2248_s29 = smov (!%p213_p2), 92   ;;  %s2249_s30 = smov (!%p213_p2), 91  }
   0x8   : > { %s2250_s7 = smov (!%p213_p2), 126   ;;  %s2251_s8 = smov (!%p213_p2), 110  }
   0x9   : > { %s2252_s9 = smov (!%p213_p2), 109   ;;  %s2253_s10 = smov (!%p213_p2), 127  }
   0xa   : > { %s2257_s11 = smov (!%p213_p2), 17   ;;  %s2258_s12 = smov (!%p213_p2), 18  }
   0xb   : > { %s2894_s22 = smov (!%p242_p3, %s2016_s22), 1  ;;  %v2254_v46 = vmov 0.0   ;;  %v2370_v47 = vld [vmem:[%s2887_s1] sm:$0xff]  ;;  %vm538_vm0 = vcmask 220160   ;;  %v272_v61 = vld [vmem:[%s2888_s2 + $0x18] sm:$0xff]  ;;  %v271_v62 = vld [vmem:[%s2888_s2 + $0x10] sm:$0xff] }
   0xc   : > { %s2104_s23 = sshll.u32 %s2894_s22, 4  ;;  %625 = vmatprep.mubr.f32.mxu0 %v2254_v46  ;;  %2154 = vmatprep.mubr.msk.f32.mxu1 %vm538_vm0, %v2370_v47  ;;  %v2255_v63 = vmov 0   ;;  %vm496_vm1 = vcmask 736256   ;;  %vm413_vm2 = vcmask 883712   ;;  %vm444_vm3 = vcmask 752640   ;;  %s2259_s13 = smov 19  }
   0xd   : > { %s2311_s26 = scalar_lea.vmem %s2886_s0, %s2104_s23  ;;  %2194 = vset.pattern.permute.xlu1 %v2255_v63  ;;  %253 = vst [vmem:[#allocation2] sm:$0xf] %v2255_v63  ;;  %254 = vst [vmem:[#allocation2 + $0x14] sm:$0xf] %v2255_v63  ;;  %2193 = vset.pattern.permute.xlu0 %v2255_v63  ;;  %vm551_vm4 = vcmask 1042432   ;;  %vm472_vm5 = vcmask 744448  }
   0xe   : > { %v2314_v0 = vld [vmem:[%s2311_s26 + $0x8] sm:$0x77]  ;;  %v482_v1 = vld [vmem:[%s2311_s26] sm:$0x77]  ;;  %255 = vst [vmem:[#allocation2 + $0x28] sm:$0xf] %v2255_v63 }
   0xf   : > { %v395_v2 = vld [vmem:[%s2311_s26] sm:$0x77]  ;;  %492 = vrot.lane.b32.xlu0 %v2314_v0, %s2246_s27  ;;  %488 = vrot.lane.b32.xlu1 %v482_v1, %s2246_s27  ;;  %v486_v3 = vcombine.high %v482_v1, %v482_v1  ;;  %v2323_v6 = vld [vmem:[%s2311_s26 + $0x8] sm:$0x77]  ;;  %v487_v48 = vcombine.high %v2314_v0, %v2314_v0  ;;  %256 = vst [vmem:[#allocation2 + $0x3c] sm:$0xf] %v2255_v63 }
  0x10   : > { %v399_v4 = vcombine.high %v395_v2, %v395_v2  ;;  %v426_v5 = vld [vmem:[%s2311_s26] sm:$0x77]  ;;  %v403_v10 = vrot.slane %v2323_v6, 1  ;;  %v2330_v13 = vld [vmem:[%s2311_s26 + $0x8] sm:$0x77]  ;;  %v401_v18 = vrot.slane %v395_v2, 1  ;;  %v400_v45 = vcombine.high %v2323_v6, %v2323_v6 }
  0x11   : > { %v430_v7 = vcombine.high %v426_v5, %v426_v5  ;;  %v454_v8 = vld [vmem:[%s2311_s26] sm:$0x77]  ;;  %v434_v14 = vrot.slane %v2330_v13, 6  ;;  %v2336_v16 = vld [vmem:[%s2311_s26 + $0x8] sm:$0x77]  ;;  %v432_v20 = vrot.slane %v426_v5, 6  ;;  %v431_v50 = vcombine.high %v2330_v13, %v2330_v13 }
  0x12   : > { %v402_v9 = vrot.slane %v399_v4, 1  ;;  %v458_v12 = vcombine.high %v454_v8, %v454_v8  ;;  %v462_v17 = vrot.slane %v2336_v16, 3  ;;  %v312_v19 = vld [vmem:[%s2311_s26] sm:$0x77]  ;;  %v460_v21 = vrot.slane %v454_v8, 3  ;;  %v270_v1 = vld [vmem:[%s2888_s2 + $0x8] sm:$0xff] }
  0x13   : > { %490 = vrot.lane.b32.xlu0 %v486_v3, %s2246_s27  ;;  %v433_v11 = vrot.slane %v430_v7, 6  ;;  %v316_v22 = vcombine.high %v312_v19, %v312_v19  ;;  %v313_v23 = vld [vmem:[%s2311_s26 + $0x8] sm:$0x77]  ;;  %v343_v24 = vld [vmem:[%s2311_s26] sm:$0x77]  ;;  %v318_v38 = vrot.slane %v312_v19, 2  ;;  %v459_v51 = vcombine.high %v2336_v16, %v2336_v16 }
  0x14   : > { %407 = vrot.lane.b32.xlu1 %v402_v9, %s2247_s28  ;;  %v461_v15 = vrot.slane %v458_v12, 3  ;;  %v320_v25 = vrot.slane %v313_v23, 2  ;;  %v347_v27 = vcombine.high %v343_v24, %v343_v24  ;;  %v344_v28 = vld [vmem:[%s2311_s26 + $0x8] sm:$0x77]  ;;  %v371_v33 = vld [vmem:[%s2311_s26] sm:$0x77]  ;;  %v317_v55 = vcombine.high %v313_v23, %v313_v23 }
  0x15   : > { %v319_v26 = vrot.slane %v316_v22, 2  ;;  %v351_v29 = vrot.slane %v344_v28, 7  ;;  %v372_v31 = vld [vmem:[%s2311_s26 + $0x8] sm:$0x77]  ;;  %v284_v34 = vld [vmem:[%s2311_s26] sm:$0x77]  ;;  %v375_v40 = vcombine.low %v371_v33, %v371_v33  ;;  %v348_v56 = vcombine.high %v344_v28, %v344_v28 }
  0x16   : > { %v350_v30 = vrot.slane %v347_v27, 7  ;;  %v376_v32 = vcombine.low %v372_v31, %v372_v31  ;;  %v276_v35 = vld [vmem:[%s2311_s26] sm:$0x77]  ;;  %v349_v37 = vrot.slane %v343_v24, 7  ;;  %v288_v39 = vcombine.high %v284_v34, %v284_v34  ;;  %v285_v42 = vld [vmem:[%s2311_s26 + $0x8] sm:$0x77] }
  0x17   : > { %409 = vrot.lane.b32.xlu0 %v403_v10, %s2247_s28  ;;  %v279_v36 = vcombine.high %v276_v35, %v276_v35  ;;  %281 = vst [vmem:[#allocation3 + $0x30] sm:$0x7] %v276_v35  ;;  %v292_v43 = vrot.slane %v285_v42, 5  ;;  %v290_v44 = vrot.slane %v284_v34, 5  ;;  %v404_v49 = vrot.slane %v400_v45, 1  ;;  %v269_v0 = vld [vmem:[%s2888_s2] sm:$0xff] }
  0x18   : > { %438 = vrot.lane.b32.xlu1 %v433_v11, %s2248_s29  ;;  %v291_v41 = vrot.slane %v288_v39, 5  ;;  %v277_v52 = vld [vmem:[%s2311_s26 + $0x8] sm:$0x7]  ;;  %v435_v53 = vrot.slane %v431_v50, 6  ;;  %v463_v54 = vrot.slane %v459_v51, 3  ;;  %v321_v57 = vrot.slane %v317_v55, 2 }
  0x19   : > { %282 = vst [vmem:[#allocation3] sm:$0x7] %v279_v36  ;;  %283 = vst [vmem:[#allocation3 + $0x58] sm:$0x7] %v277_v52  ;;  %v352_v58 = vrot.slane %v348_v56, 7  ;;  %v289_v59 = vcombine.high %v285_v42, %v285_v42  ;;  %vm330_vm6 = vcmask 1031168  }
  0x1a   : > { %257 = vst [vmem:[#allocation2 + $0x10] sm:$0xf] %v2255_v63  ;;  %258 = vst [vmem:[#allocation2 + $0x24] sm:$0xf] %v2255_v63  ;;  %vm361_vm7 = vcmask 900096   ;;  %vm385_vm8 = vcmask 891904  }
  0x1b   : > { %440 = vrot.lane.b32.xlu0 %v434_v14, %s2248_s29  ;;  %v293_v60 = vrot.slane %v289_v59, 5  ;;  %259 = vst [vmem:[#allocation2 + $0x38] sm:$0xf] %v2255_v63  ;;  %260 = vst [vmem:[#allocation2 + $0x4c] sm:$0xf] %v2255_v63  ;;  %vm302_vm9 = vcmask 1039360  }
  0x1c   : > { %466 = vrot.lane.b32.xlu1 %v461_v15, %s2249_s30  ;;  %s2260_s14 = smov 111   ;;  %vm863_vm10 = vcmask 1043456   ;;  %vm1072_vm11 = vcmask 7168   ;;  %vm1003_vm12 = vcmask 138240   ;;  %vm934_vm13 = vcmask 146432   ;;  %s2168_s24 = smul.u32 48, %s2894_s22 }
  0x1d   : > { %vm865_vm14 = vcmask 154624   ;;  %vm1226_vm15 = vcmask 908288  }
  0x1f   : > { %468 = vrot.lane.b32.xlu0 %v462_v17, %s2249_s30 }
  0x20   : > { %405 = vrot.lane.b32.xlu1 %v401_v18, %s2247_s28 }
  0x23   : > { %436 = vrot.lane.b32.xlu0 %v432_v20, %s2248_s29 }
  0x24   : > { %464 = vrot.lane.b32.xlu1 %v460_v21, %s2249_s30 }
  0x27   : > { %324 = vrot.lane.b32.xlu0 %v319_v26, %s2250_s7 }
  0x28   : > { %326 = vrot.lane.b32.xlu1 %v320_v25, %s2250_s7 }
  0x2b   : > { %355 = vrot.lane.b32.xlu0 %v350_v30, %s2251_s8 }
  0x2c   : > { %357 = vrot.lane.b32.xlu1 %v351_v29, %s2251_s8 }
  0x2f   : > { %379 = vrot.lane.b32.xlu0 %v371_v33, %s2252_s9 }
  0x30   : > { %381 = vrot.lane.b32.xlu1 %v376_v32, %s2252_s9 }
  0x33   : > { %322 = vrot.lane.b32.xlu0 %v318_v38, %s2250_s7 }
  0x34   : > { %353 = vrot.lane.b32.xlu1 %v349_v37, %s2251_s8 }
  0x37   : > { %377 = vrot.lane.b32.xlu0 %v375_v40, %s2252_s9 }
  0x38   : > { %296 = vrot.lane.b32.xlu1 %v291_v41, %s2253_s10 }
  0x3b   : > { %298 = vrot.lane.b32.xlu0 %v292_v43, %s2253_s10 }
  0x3c   : > { %294 = vrot.lane.b32.xlu1 %v290_v44, %s2253_s10 }
  0x3f   : > { %494 = vrot.lane.b32.xlu0 %v487_v48, %s2246_s27  ;;  %s251_s27 = scalar_lea.vmem %s2892_s6, %s2168_s24 }
  0x40   : > { %411 = vrot.lane.b32.xlu1 %v404_v49, %s2247_s28 }
  0x43   : > { %442 = vrot.lane.b32.xlu0 %v435_v53, %s2248_s29 }
  0x44   : > { %470 = vrot.lane.b32.xlu1 %v463_v54, %s2249_s30 }
  0x47   : > { %328 = vrot.lane.b32.xlu0 %v321_v57, %s2250_s7  ;;  %s2256_s7 = smov 1  }
  0x48   : > { %359 = vrot.lane.b32.xlu1 %v352_v58, %s2251_s8 }
  0x4b   : > { %383 = vrot.lane.b32.xlu0 %v372_v31, %s2252_s9 }
  0x4c   : > { %300 = vrot.lane.b32.xlu1 %v293_v60, %s2253_s10 }
  0x4f   : > { %530 = vperm.xlu0 %2193, %v271_v62  }
  0x50   : > { %535 = vperm.xlu1 %2194, %v272_v61  }
  0x53   : > { %525 = vperm.xlu0 %2193, %v270_v1  }
  0x54   : > { %520 = vperm.xlu1 %2194, %v269_v0  }
  0x81   : > { %v2413_v2 = vpop.permute.xlu0 %492  ;;  %v489_v3 = vpop.permute.xlu1 %488 }
  0x85   : > { %v491_v4 = vpop.permute.xlu0 %490 }
  0x86   : > { %v408_v5 = vpop.permute.xlu1 %407  ;;  %v497_v6 = vsel %vm496_vm1, %v489_v3, %v491_v4  ;;  %v498_v7 = vsel %vm496_vm1, %v491_v4, %v2413_v2 }
  0x87   : > { %503 = vst [vmem:[#allocation3 + $0x48] sm:$0x7] %v497_v6  ;;  %504 = vst [vmem:[#allocation3 + $0x10] sm:$0x7] %v498_v7  ;;  %v263_v7 = vld [vmem:[%s2887_s1 + $0x10] sm:$0xff] }
  0x89   : > { %v2418_v8 = vpop.permute.xlu0 %409 }
  0x8a   : > { %v439_v9 = vpop.permute.xlu1 %438  ;;  %v415_v10 = vsel %vm413_vm2, %v408_v5, %v2418_v8 }
  0x8b   : > { %421 = vst [vmem:[#allocation3 + $0x38] ss:$28 sps:$4 sm:$0x83] %v415_v10  }
  0x8d   : > { %v2422_v11 = vpop.permute.xlu0 %440 }
  0x8e   : > { %v467_v12 = vpop.permute.xlu1 %466  ;;  %v446_v13 = vsel %vm444_vm3, %v439_v9, %v2422_v11  ;;  %v516_v14 = vld [vmem:[#allocation3 + $0x10] sm:$0x7]  ;;  %v515_v15 = vld [vmem:[#allocation3 + $0x48] sm:$0x7] }
  0x8f   : > { %452 = vst [vmem:[#allocation3 + $0x38] sm:$0x1c] %v446_v13  ;;  %2024 = vmatprep.subr.msk.mxu0 %vm551_vm4, %v516_v14 }
  0x90   : > { %2025 = vmatpush1.msk.msra.mxu0 %vm551_vm4, %v515_v15 }
  0x91   : > { %v469_v16 = vpop.permute.xlu0 %468 }
  0x92   : > { %v406_v17 = vpop.permute.xlu1 %405  ;;  %v474_v18 = vsel %vm472_vm5, %v467_v12, %v469_v16 }
  0x93   : > { %v414_v19 = vsel %vm413_vm2, %v406_v17, %v408_v5  ;;  %480 = vst [vmem:[#allocation3 + $0x38] sm:$0xe0] %v474_v18 }
  0x94   : > { %420 = vst [vmem:[#allocation3 + $0x8] ss:$20 sps:$4 sm:$0x83] %v414_v19  }
  0x95   : > { %v437_v20 = vpop.permute.xlu0 %436 }
  0x96   : > { %v465_v21 = vpop.permute.xlu1 %464  ;;  %v445_v22 = vsel %vm444_vm3, %v437_v20, %v439_v9 }
  0x97   : > { %v473_v23 = vsel %vm472_vm5, %v465_v21, %v467_v12  ;;  %451 = vst [vmem:[#allocation3 + $0x8] sm:$0x1c] %v445_v22 }
  0x98   : > { %479 = vst [vmem:[#allocation3 + $0x8] sm:$0xe0] %v473_v23 }
  0x99   : > { %v325_v25 = vpop.permute.xlu0 %324 }
  0x9a   : > { %v327_v24 = vpop.permute.xlu1 %326  ;;  %v513_v27 = vld [vmem:[#allocation3 + $0x38] sm:$0xff] }
  0x9b   : > { %v332_v26 = vsel %vm330_vm6, %v325_v25, %v327_v24  ;;  %587 = vmatprep.subr.mxu0 %v513_v27 }
  0x9c   : > { %338 = vst [vmem:[#allocation3 + $0x50] ss:$-76 sps:$4 sm:$0xc1] %v332_v26  }
  0x9d   : > { %v356_v29 = vpop.permute.xlu0 %355 }
  0x9e   : > { %v358_v28 = vpop.permute.xlu1 %357 }
  0x9f   : > { %v363_v30 = vsel %vm361_vm7, %v356_v29, %v358_v28  ;;  %v512_v31 = vld [vmem:[#allocation3 + $0x8] sm:$0xff] }
  0xa0   : > { %369 = vst [vmem:[#allocation3 + $0x50] sm:$0xe] %v363_v30  ;;  %588 = vmatpush1.msra.mxu0 %v512_v31 }
  0xa1   : > { %v380_v33 = vpop.permute.xlu0 %379 }
  0xa2   : > { %v382_v32 = vpop.permute.xlu1 %381 }
  0xa3   : > { %v387_v34 = vsel %vm385_vm8, %v380_v33, %v382_v32 }
  0xa4   : > { %393 = vst [vmem:[#allocation3 + $0x50] sm:$0x70] %v387_v34 }
  0xa5   : > { %v323_v36 = vpop.permute.xlu0 %322 }
  0xa6   : > { %v354_v35 = vpop.permute.xlu1 %353  ;;  %v331_v38 = vsel %vm330_vm6, %v323_v36, %v325_v25 }
  0xa7   : > { %v362_v37 = vsel %vm361_vm7, %v354_v35, %v356_v29  ;;  %337 = vst [vmem:[#allocation3 + $0x18] ss:$28 sps:$4 sm:$0xc1] %v331_v38  }
  0xa8   : > { %368 = vst [vmem:[#allocation3 + $0x18] sm:$0xe] %v362_v37 }
  0xa9   : > { %v378_v39 = vpop.permute.xlu0 %377 }
  0xaa   : > { %v297_v40 = vpop.permute.xlu1 %296  ;;  %v386_v41 = vsel %vm385_vm8, %v378_v39, %v380_v33 }
  0xab   : > { %v510_v42 = vld [vmem:[#allocation3 + $0x50] sm:$0xff]  ;;  %392 = vst [vmem:[#allocation3 + $0x18] sm:$0x70] %v386_v41 }
  0xac   : > { %589 = vmatprep.subr.mxu0 %v510_v42 }
  0xad   : > { %v299_v43 = vpop.permute.xlu0 %298 }
  0xae   : > { %v295_v44 = vpop.permute.xlu1 %294  ;;  %v304_v45 = vsel %vm302_vm9, %v297_v40, %v299_v43 }
  0xaf   : > { %v303_v48 = vsel %vm302_vm9, %v295_v44, %v297_v40  ;;  %310 = vst [vmem:[#allocation3] sm:$0x38] %v304_v45 }
  0xb0   : > { %309 = vst [vmem:[#allocation3 + $0x30] sm:$0x38] %v303_v48 }
  0xb1   : > { %v495_v49 = vpop.permute.xlu0 %494 }
  0xb2   : > { %v412_v50 = vpop.permute.xlu1 %411  ;;  %v499_v51 = vsel %vm496_vm1, %v2413_v2, %v495_v49  ;;  %v509_v53 = vld [vmem:[#allocation3 + $0x18] sm:$0xff]  ;;  %vm2261_vm1 = vmmov 0  }
  0xb3   : > { %v416_v52 = vsel %vm413_vm2, %v2418_v8, %v412_v50  ;;  %505 = vst [vmem:[#allocation3 + $0x40] sm:$0x7] %v499_v51  ;;  %590 = vmatpush1.msra.mxu0 %v509_v53  ;;  %v262_v2 = vld [vmem:[%s2887_s1 + $0x8] sm:$0xff]  ;;  %v264_v8 = vld [vmem:[%s2887_s1 + $0x18] sm:$0xff] }
  0xb4   : > { %422 = vst [vmem:[#allocation3 + $0x28] ss:$-4 sps:$4 sm:$0x83] %v416_v52  }
  0xb5   : > { %v443_v54 = vpop.permute.xlu0 %442 }
  0xb6   : > { %v471_v55 = vpop.permute.xlu1 %470  ;;  %v447_v56 = vsel %vm444_vm3, %v2422_v11, %v443_v54  ;;  %v507_v58 = vld [vmem:[#allocation3] sm:$0xff]  ;;  %v748_v11 = vlaneseq }
  0xb7   : > { %v475_v57 = vsel %vm472_vm5, %v469_v16, %v471_v55  ;;  %v506_v59 = vld [vmem:[#allocation3 + $0x30] sm:$0xff]  ;;  %453 = vst [vmem:[#allocation3 + $0x28] sm:$0x1c] %v447_v56  ;;  %591 = vmatprep.subr.mxu0 %v507_v58 }
  0xb8   : > { %481 = vst [vmem:[#allocation3 + $0x28] sm:$0xe0] %v475_v57  ;;  %592 = vmatpush1.msra.mxu0 %v506_v59  ;;  %v749_v13 = vshrl.u32 %v748_v11, 7  ;;  %v275_v16 = vld [vmem:[%s2891_s5] sm:$0x7] }
  0xb9   : > { %v329_v60 = vpop.permute.xlu0 %328  ;;  %2026 = vmatmul.mubr.msk.f32.vlgmr.msra.gmra.mxu0 %vm538_vm0, %v2370_v47 }
  0xba   : > { %v360_v61 = vpop.permute.xlu1 %359  ;;  %v333_v62 = vsel %vm330_vm6, %v327_v24, %v329_v60  ;;  %v517_v1 = vld [vmem:[#allocation3 + $0x40] sm:$0x7]  ;;  %631 = vmatprep.mubr.f32.mxu0 %v2254_v46  ;;  %v750_v15 = vsub.s32 0, %v749_v13  ;;  %v754_v18 = vsub.s32 1, %v749_v13  ;;  %v758_v54 = vsub.s32 2, %v749_v13 }
  0xbb   : > { %v364_v0 = vsel %vm361_vm7, %v358_v28, %v360_v61  ;;  %339 = vst [vmem:[#allocation3 + $0x20] ss:$60 sps:$4 sm:$0xc1] %v333_v62   ;;  %2146 = vmatprep.subr.msk.mxu1 %vm551_vm4, %v517_v1 }
  0xbc   : > { %370 = vst [vmem:[#allocation3 + $0x20] sm:$0xe] %v364_v0  ;;  %2147 = vmatpush3.msk.msra.mxu1 %vm551_vm4, %v517_v1  ;;  %v751_v20 = vrot.slane %v275_v16, %v750_v15  ;;  %v755_v25 = vrot.slane %v275_v16, %v754_v18  ;;  %v759_v0 = vrot.slane %v275_v16, %v758_v54 }
  0xbd   : > { %v384_v3 = vpop.permute.xlu0 %383  ;;  %2027 = vmatmul.mubr.msk.f32.gmra.mxu0 %vm538_vm0, %v262_v2 }
  0xbe   : > { %v301_v4 = vpop.permute.xlu1 %300  ;;  %v388_v47 = vsel %vm385_vm8, %v382_v32, %v384_v3  ;;  %637 = vmatprep.mubr.f32.mxu0 %v2254_v46 }
  0xbf   : > { %v305_v5 = vsel %vm302_vm9, %v299_v43, %v301_v4  ;;  %v514_v6 = vld [vmem:[#allocation3 + $0x28] sm:$0xff]  ;;  %394 = vst [vmem:[#allocation3 + $0x20] sm:$0x70] %v388_v47 }
  0xc0   : > { %311 = vst [vmem:[#allocation3 + $0x58] sm:$0x38] %v305_v5  ;;  %2148 = vmatprep.subr.mxu1 %v514_v6 }
  0xc1   : > { %2149 = vmatpush3.msra.mxu1 %v514_v6  ;;  %2028 = vmatmul.mubr.msk.f32.gmra.mxu0 %vm538_vm0, %v263_v7 }
  0xc2   : > { %643 = vmatprep.mubr.f32.mxu0 %v2254_v46 }
  0xc5   : > { %2029 = vmatmul.mubr.msk.f32.gmra.mxu0 %vm538_vm0, %v264_v8 }
  0xc6   : > { %v511_v9 = vld [vmem:[#allocation3 + $0x20] sm:$0xff] }
  0xc7   : > { %2150 = vmatprep.subr.mxu1 %v511_v9  ;;  %v508_v10 = vld [vmem:[#allocation3 + $0x58] sm:$0xff] }
  0xc8   : > { %2151 = vmatpush3.msra.mxu1 %v511_v9 }
  0xc9   : > { %2152 = vmatprep.subr.mxu1 %v508_v10 }
  0xca   : > { %2153 = vmatpush3.msra.mxu1 %v508_v10  ;;  %v2476_v14 = vpop.permute.xlu0 %530 }
  0xcb   : > { %2155 = vmatmul.mubr.msk.f32.vlgmr.msra.gmra.mxu1 %vm538_vm0, %v262_v2  ;;  %v2474_v12 = vpop.permute.xlu1 %535 }
  0xcc   : > { %2157 = vmatprep.mubr.msk.f32.mxu1 %vm538_vm0, %v263_v7 }
  0xce   : > { %v526_v23 = vpop.permute.xlu0 %525 }
  0xcf   : > { %2158 = vmatmul.mubr.msk.f32.gmra.mxu1 %vm538_vm0, %v264_v8  ;;  %v521_v17 = vpop.permute.xlu1 %520  ;;  %vm1777_vm0 = vcmask 261120  }
  0xd0   : > { %1856 = vmatprep.mubr.bf16.mxu1 %v2255_v63 }
 0x179   : > { %v627_v19 = vpop.f32.mrf.mxu0 }
 0x17a   : > { %v628_v21 = vadd.f32 %v627_v19, %v521_v17 }
 0x17b   : > { %v629_v22 = vpop.f32.mrf.mxu0 }
 0x17c   : > { %v735_v24 = vmax.f32 %v628_v21, 0.0  ;;  %v630_v63 = vadd.f32 %v629_v22, %v521_v17 }
 0x17d   : > { %v633_v26 = vpop.f32.mrf.mxu0 }
 0x17e   : > { %v763_v27 = vmul.f32 %v751_v20, %v735_v24  ;;  %v736_v28 = vmax.f32 %v630_v63, 0.0  ;;  %v634_v29 = vadd.f32 %v633_v26, %v526_v23 }
 0x17f   : > { %v635_v30 = vpop.f32.mrf.mxu0 }
 0x180   : > { %v764_v31 = vmul.f32 %v755_v25, %v736_v28  ;;  %v636_v32 = vadd.f32 %v635_v30, %v526_v23  ;;  %v738_v33 = vmax.f32 %v634_v29, 0.0 }
 0x181   : > { %v639_v34 = vpop.f32.mrf.mxu0 }
 0x182   : > { %v2481_v35 = vpack.c.bf16 %v764_v31, %v763_v27  ;;  %v640_v36 = vadd.f32 %v639_v34, %v2476_v14  ;;  %v739_v37 = vmax.f32 %v636_v32, 0.0  ;;  %v766_v38 = vmul.f32 %v751_v20, %v738_v33 }
 0x183   : > { %v641_v39 = vpop.f32.mrf.mxu0 }
 0x184   : > { %815 = vst [vmem:[#allocation2 + $0x4] sm:$0xff] %v2481_v35  ;;  %v741_v40 = vmax.f32 %v640_v36, 0.0  ;;  %v642_v41 = vadd.f32 %v641_v39, %v2476_v14  ;;  %v767_v42 = vmul.f32 %v755_v25, %v739_v37 }
 0x185   : > { %v645_v43 = vpop.f32.mrf.mxu0 }
 0x186   : > { %v769_v44 = vmul.f32 %v751_v20, %v741_v40  ;;  %v742_v45 = vmax.f32 %v642_v41, 0.0  ;;  %v646_v48 = vadd.f32 %v645_v43, %v2474_v12  ;;  %v2487_v49 = vpack.c.bf16 %v767_v42, %v766_v38 }
 0x187   : > { %v647_v50 = vpop.f32.mrf.mxu0 }
 0x188   : > { %v770_v51 = vmul.f32 %v755_v25, %v742_v45  ;;  %v744_v52 = vmax.f32 %v646_v48, 0.0  ;;  %817 = vst [vmem:[#allocation2 + $0x18] sm:$0xff] %v2487_v49  ;;  %v648_v53 = vadd.f32 %v647_v50, %v2474_v12 }
 0x18a   : > { %v2491_v55 = vpack.c.bf16 %v770_v51, %v769_v44  ;;  %v745_v56 = vmax.f32 %v648_v53, 0.0  ;;  %v772_v60 = vmul.f32 %v751_v20, %v744_v52  ;;  %v273_v44 = vld [vmem:[%s2890_s4] sm:$0xff] }
 0x18b   : > { %v2156_v57 = vpop.f32.mrf.mxu1  ;;  %v1031_v58 = vld [vmem:[#allocation2] sm:$0xff] }
 0x18c   : > { %v2493_v59 = vld [vmem:[#allocation2 + $0x4] sm:$0xff]  ;;  %819 = vst [vmem:[#allocation2 + $0x2c] sm:$0xff] %v2491_v55  ;;  %v773_v61 = vmul.f32 %v755_v25, %v745_v56  ;;  %v722_v62 = vadd.f32 %v2156_v57, %v526_v23  ;;  %1047 = vrot.lane.b32.xlu1 %v1031_v58, %s2256_s7 }
 0x18d   : > { %v716_v1 = vpop.f32.mrf.mxu1 }
 0x18e   : > { %v2497_v2 = vpack.c.bf16 %v773_v61, %v772_v60  ;;  %v740_v3 = vmax.f32 %v722_v62, 0.0  ;;  %v717_v4 = vadd.f32 %v716_v1, %v521_v17 }
 0x18f   : > { %v2159_v47 = vpop.f32.mrf.mxu1  ;;  %v2499_v5 = vld [vmem:[#allocation2 + $0x18] sm:$0xff] }
 0x190   : > { %821 = vst [vmem:[#allocation2 + $0x40] sm:$0xff] %v2497_v2  ;;  %v768_v6 = vmul.f32 %v759_v0, %v740_v3  ;;  %v737_v7 = vmax.f32 %v717_v4, 0.0  ;;  %v732_v8 = vadd.f32 %v2159_v47, %v2474_v12  ;;  %978 = vrot.lane.b32.xlu1 %v1031_v58, %s2257_s11  ;;  %v2070_v9 = vcombine.low %v2493_v59, %v2499_v5  ;;  %v1033_v32 = vld [vmem:[#allocation2 + $0x14] sm:$0xff]  ;;  %v274_v3 = vld [vmem:[%s2890_s4 + $0x8] sm:$0xff] }
 0x191   : > { %v726_v10 = vpop.f32.mrf.mxu1  ;;  %v2071_v11 = vcombine.high %v2493_v59, %v2499_v5 }
 0x192   : > { %v2108_v13 = vpack.c.bf16 %v768_v6, %v768_v6  ;;  %v765_v15 = vmul.f32 %v759_v0, %v737_v7  ;;  %v746_v16 = vmax.f32 %v732_v8, 0.0  ;;  %v727_v17 = vadd.f32 %v726_v10, %v2476_v14 }
 0x193   : > { %v2509_v18 = vld [vmem:[#allocation2 + $0x2c] sm:$0xff] }
 0x194   : > { %818 = vst [vmem:[#allocation2 + $0x20] sm:$0xf] %v2108_v13  ;;  %v2106_v19 = vpack.c.bf16 %v765_v15, %v765_v15  ;;  %v774_v12 = vmul.f32 %v759_v0, %v746_v16  ;;  %v743_v20 = vmax.f32 %v727_v17, 0.0  ;;  %909 = vrot.lane.b32.xlu1 %v1031_v58, %s2258_s12  ;;  %v1035_v36 = vld [vmem:[#allocation2 + $0x28] sm:$0xff] }
 0x196   : > { %816 = vst [vmem:[#allocation2 + $0xc] sm:$0xf] %v2106_v19  ;;  %v2112_v21 = vpack.c.bf16 %v774_v12, %v774_v12  ;;  %v771_v22 = vmul.f32 %v759_v0, %v743_v20  ;;  %v2624_v0 = vld [vmem:[%s2889_s3 + $0x4] ss:$12 sps:$4 sm:$0xff]  }
 0x197   : > { %v2512_v23 = vld [vmem:[#allocation2 + $0x40] sm:$0xff]  ;;  %1813 = vmatprep.mubr.bf16.mxu0 %v2624_v0 }
 0x198   : > { %822 = vst [vmem:[#allocation2 + $0x48] sm:$0xf] %v2112_v21  ;;  %v2110_v24 = vpack.c.bf16 %v771_v22, %v771_v22  ;;  %1339 = vrot.lane.b32.xlu1 %v2481_v35, %s2252_s9  ;;  %v2073_v14 = vcombine.low %v2509_v18, %v2512_v23  ;;  %v2074_v63 = vcombine.high %v2509_v18, %v2512_v23  ;;  %v1037_v39 = vld [vmem:[#allocation2 + $0x3c] sm:$0xff] }
 0x19a   : > { %820 = vst [vmem:[#allocation2 + $0x34] sm:$0xf] %v2110_v24 }
 0x19b   : > { %v1103_v25 = vld [vmem:[#allocation2 + $0x20] sm:$0xf] }
 0x19c   : > { %v2520_v26 = vld [vmem:[#allocation2 + $0x20] sm:$0xff]  ;;  %1111 = vst [vmem:[#allocation4 + $0xd4] sm:$0xf] %v1103_v25  ;;  %839 = vrot.lane.b32.xlu1 %v1031_v58, %s2259_s13 }
 0x19d   : > { %1345 = vrot.lane.b32.xlu0 %v2520_v26, %s2252_s9  ;;  %v1101_v27 = vld [vmem:[#allocation2 + $0xc] sm:$0xf]  ;;  %v1034_v37 = vld [vmem:[#allocation2 + $0x1c] sm:$0xff] }
 0x19e   : > { %1109 = vst [vmem:[#allocation4 + $0xc8] sm:$0xf] %v1101_v27  ;;  %v2525_v29 = vld [vmem:[#allocation2 + $0xc] sm:$0xff] }
 0x19f   : > { %v1107_v28 = vld [vmem:[#allocation2 + $0x48] sm:$0xf] }
 0x1a0   : > { %1115 = vst [vmem:[#allocation4 + $0xec] sm:$0xf] %v1107_v28  ;;  %1272 = vrot.lane.b32.xlu1 %v2525_v29, %s2251_s8  ;;  %v1032_v31 = vld [vmem:[#allocation2 + $0x8] sm:$0xff] }
 0x1a1   : > { %1276 = vrot.lane.b32.xlu0 %v2520_v26, %s2251_s8  ;;  %v1105_v30 = vld [vmem:[#allocation2 + $0x34] sm:$0xf]  ;;  %v1330_v33 = vld [vmem:[#allocation2 + $0x48] sm:$0xff] }
 0x1a2   : > { %1113 = vst [vmem:[#allocation4 + $0xe0] sm:$0xf] %v1105_v30  ;;  %v1259_v34 = vld [vmem:[#allocation2 + $0x34] sm:$0xff]  ;;  %v1038_v40 = vld [vmem:[#allocation2 + $0x44] sm:$0xff] }
 0x1a3   : > { %v1036_v38 = vld [vmem:[#allocation2 + $0x30] sm:$0xff] }
 0x1a4   : > { %1051 = vrot.lane.b32.xlu1 %v1033_v32, %s2256_s7 }
 0x1a5   : > { %1049 = vrot.lane.b32.xlu0 %v1032_v31, %s2256_s7 }
 0x1a8   : > { %982 = vrot.lane.b32.xlu1 %v1033_v32, %s2257_s11 }
 0x1a9   : > { %980 = vrot.lane.b32.xlu0 %v1032_v31, %s2257_s11 }
 0x1ac   : > { %913 = vrot.lane.b32.xlu1 %v1033_v32, %s2258_s12 }
 0x1ad   : > { %911 = vrot.lane.b32.xlu0 %v1032_v31, %s2258_s12 }
 0x1b0   : > { %1343 = vrot.lane.b32.xlu1 %v2487_v49, %s2252_s9 }
 0x1b1   : > { %1341 = vrot.lane.b32.xlu0 %v2525_v29, %s2252_s9 }
 0x1b4   : > { %843 = vrot.lane.b32.xlu1 %v1033_v32, %s2259_s13 }
 0x1b5   : > { %841 = vrot.lane.b32.xlu0 %v1032_v31, %s2259_s13 }
 0x1b8   : > { %1280 = vrot.lane.b32.xlu1 %v1259_v34, %s2251_s8 }
 0x1b9   : > { %1353 = vrot.lane.b32.xlu0 %v1330_v33, %s2252_s9 }
 0x1bc   : > { %1055 = vrot.lane.b32.xlu1 %v1035_v36, %s2256_s7 }
 0x1bd   : > { %1284 = vrot.lane.b32.xlu0 %v1330_v33, %s2251_s8 }
 0x1c0   : > { %986 = vrot.lane.b32.xlu1 %v1035_v36, %s2257_s11 }
 0x1c1   : > { %1053 = vrot.lane.b32.xlu0 %v1034_v37, %s2256_s7 }
 0x1c4   : > { %917 = vrot.lane.b32.xlu1 %v1035_v36, %s2258_s12 }
 0x1c5   : > { %984 = vrot.lane.b32.xlu0 %v1034_v37, %s2257_s11 }
 0x1c8   : > { %1347 = vrot.lane.b32.xlu1 %v2491_v55, %s2252_s9 }
 0x1c9   : > { %915 = vrot.lane.b32.xlu0 %v1034_v37, %s2258_s12 }
 0x1cc   : > { %847 = vrot.lane.b32.xlu1 %v1035_v36, %s2259_s13 }
 0x1cd   : > { %1349 = vrot.lane.b32.xlu0 %v1259_v34, %s2252_s9 }
 0x1d0   : > { %1278 = vrot.lane.b32.xlu1 %v2491_v55, %s2251_s8 }
 0x1d1   : > { %845 = vrot.lane.b32.xlu0 %v1034_v37, %s2259_s13 }
 0x1d4   : > { %1059 = vrot.lane.b32.xlu1 %v1037_v39, %s2256_s7 }
 0x1d5   : > { %1057 = vrot.lane.b32.xlu0 %v1036_v38, %s2256_s7 }
 0x1d8   : > { %1270 = vrot.lane.b32.xlu1 %v2481_v35, %s2251_s8 }
 0x1d9   : > { %988 = vrot.lane.b32.xlu0 %v1036_v38, %s2257_s11 }
 0x1dc   : > { %990 = vrot.lane.b32.xlu1 %v1037_v39, %s2257_s11 }
 0x1dd   : > { %919 = vrot.lane.b32.xlu0 %v1036_v38, %s2258_s12 }
 0x1e0   : > { %1211 = vrot.lane.b32.xlu1 %v1259_v34, %s2260_s14 }
 0x1e1   : > { %849 = vrot.lane.b32.xlu0 %v1036_v38, %s2259_s13 }
 0x1e4   : > { %921 = vrot.lane.b32.xlu1 %v1037_v39, %s2258_s12 }
 0x1e5   : > { %1061 = vrot.lane.b32.xlu0 %v1038_v40, %s2256_s7 }
 0x1e8   : > { %1351 = vrot.lane.b32.xlu1 %v2497_v2, %s2252_s9 }
 0x1e9   : > { %1274 = vrot.lane.b32.xlu0 %v2487_v49, %s2251_s8 }
 0x1ec   : > { %851 = vrot.lane.b32.xlu1 %v1037_v39, %s2259_s13 }
 0x1ed   : > { %992 = vrot.lane.b32.xlu0 %v1038_v40, %s2257_s11 }
 0x1f0   : > { %1209 = vrot.lane.b32.xlu1 %v2491_v55, %s2260_s14 }
 0x1f1   : > { %1215 = vrot.lane.b32.xlu0 %v1330_v33, %s2260_s14 }
 0x1f4   : > { %1203 = vrot.lane.b32.xlu1 %v2525_v29, %s2260_s14 }
 0x1f5   : > { %923 = vrot.lane.b32.xlu0 %v1038_v40, %s2258_s12 }
 0x1f8   : > { %1201 = vrot.lane.b32.xlu1 %v2481_v35, %s2260_s14 }
 0x1f9   : > { %1207 = vrot.lane.b32.xlu0 %v2520_v26, %s2260_s14 }
 0x1fc   : > { %1142 = vrot.lane.b32.xlu1 %v1259_v34, %s2253_s10 }
 0x1fd   : > { %853 = vrot.lane.b32.xlu0 %v1038_v40, %s2259_s13 }
 0x1fe   : > { %v1048_v41 = vpop.permute.xlu1 %1047 }
 0x1ff   : > { %v1063_v61 = vrot.slane %v1048_v41, 4 }
 0x200   : > { %1140 = vrot.lane.b32.xlu1 %v2491_v55, %s2253_s10 }
 0x201   : > { %1205 = vrot.lane.b32.xlu0 %v2487_v49, %s2260_s14 }
 0x202   : > { %v979_v42 = vpop.permute.xlu1 %978 }
 0x203   : > { %v994_v6 = vrot.slane %v979_v42, 4 }
 0x204   : > { %1134 = vrot.lane.b32.xlu1 %v2525_v29, %s2253_s10 }
 0x205   : > { %1282 = vrot.lane.b32.xlu0 %v2497_v2, %s2251_s8 }
 0x206   : > { %v910_v43 = vpop.permute.xlu1 %909 }
 0x207   : > { %v925_v17 = vrot.slane %v910_v43, 4 }
 0x208   : > { %1132 = vrot.lane.b32.xlu1 %v2481_v35, %s2253_s10 }
 0x209   : > { %1146 = vrot.lane.b32.xlu0 %v1330_v33, %s2253_s10 }
 0x20a   : > { %v1340_v45 = vpop.permute.xlu1 %1339 }
 0x20b   : > { %v1355_v25 = vrot.slane %v1340_v45, 4 }
 0x20c   : > { %1466 = vperm.xlu1 %2194, %v273_v44  }
 0x20d   : > { %1213 = vrot.lane.b32.xlu0 %v2497_v2, %s2260_s14 }
 0x20e   : > { %v2596_v50 = vpop.permute.xlu1 %839 }
 0x20f   : > { %v1346_v48 = vpop.permute.xlu0 %1345  ;;  %v855_v36 = vrot.slane %v2596_v50, 4 }
 0x210   : > { %v1358_v51 = vrot.slane %v1346_v48, 4 }
 0x211   : > { %1138 = vrot.lane.b32.xlu0 %v2520_v26, %s2253_s10 }
 0x212   : > { %v1369_v52 = vsel %vm385_vm8, %v1346_v48, %v1358_v51  ;;  %v2603_v35 = vpop.permute.xlu1 %1272 }
 0x213   : > { %1387 = vst [vmem:[#allocation4 + $0x194] sm:$0xf] %v1369_v52  ;;  %v2601_v53 = vpop.permute.xlu0 %1276  ;;  %v1287_v55 = vrot.slane %v2603_v35, 4 }
 0x214   : > { %v1289_v54 = vrot.slane %v2601_v53, 4 }
 0x215   : > { %1144 = vrot.lane.b32.xlu0 %v2497_v2, %s2253_s10  ;;  %v1297_v57 = vsel %vm361_vm7, %v2603_v35, %v1287_v55 }
 0x216   : > { %v1300_v56 = vsel %vm361_vm7, %v2601_v53, %v1289_v54  ;;  %1316 = vst [vmem:[#allocation4 + $0x158] sm:$0xf] %v1297_v57  ;;  %v2617_v60 = vpop.permute.xlu1 %1051 }
 0x217   : > { %1318 = vst [vmem:[#allocation4 + $0x164] sm:$0xf] %v1300_v56  ;;  %v1050_v58 = vpop.permute.xlu0 %1049 }
 0x218   : > { %v1064_v62 = vrot.slane %v1050_v58, 4 }
 0x219   : > { %1136 = vrot.lane.b32.xlu0 %v2487_v49, %s2253_s10 }
 0x21a   : > { %v1071_v1 = vsel %vm863_vm10, %v1063_v61, %v1064_v62  ;;  %v1074_v2 = vsel %vm1072_vm11, %v1050_v58, %v1064_v62  ;;  %v2634_v49 = vpop.permute.xlu1 %982  ;;  %v1065_v61 = vrot.slane %v2617_v60, 4 }
 0x21b   : > { %v2632_v4 = vsel %vm1072_vm11, %v1048_v41, %v1071_v1  ;;  %1093 = vst [vmem:[#allocation4 + $0x98] sm:$0xf] %v1074_v2  ;;  %v981_v47 = vpop.permute.xlu0 %980 }
 0x21c   : > { %v995_v7 = vrot.slane %v981_v47, 4 }
 0x21d   : > { %1471 = vperm.xlu0 %2193, %v274_v3  }
 0x21e   : > { %v1002_v8 = vsel %vm863_vm10, %v994_v6, %v995_v7  ;;  %v1005_v10 = vsel %vm1003_vm12, %v981_v47, %v995_v7  ;;  %v2642_v16 = vpop.permute.xlu1 %913  ;;  %v996_v7 = vrot.slane %v2634_v49, 4 }
 0x21f   : > { %v2640_v13 = vsel %vm1003_vm12, %v979_v42, %v1002_v8  ;;  %1024 = vst [vmem:[#allocation4 + $0x68] sm:$0xf] %v1005_v10  ;;  %v912_v15 = vpop.permute.xlu0 %911 }
 0x220   : > { %v926_v19 = vrot.slane %v912_v15, 4 }
 0x222   : > { %v933_v12 = vsel %vm863_vm10, %v925_v17, %v926_v19  ;;  %v936_v20 = vsel %vm934_vm13, %v912_v15, %v926_v19  ;;  %v1344_v24 = vpop.permute.xlu1 %1343 }
 0x223   : > { %v2647_v21 = vsel %vm934_vm13, %v910_v43, %v933_v12  ;;  %955 = vst [vmem:[#allocation4 + $0x38] sm:$0xf] %v936_v20  ;;  %v1342_v22 = vpop.permute.xlu0 %1341  ;;  %v1357_v27 = vrot.slane %v1344_v24, 4 }
 0x224   : > { %v1356_v26 = vrot.slane %v1342_v22, 4 }
 0x225   : > { %v1367_v30 = vsel %vm863_vm10, %v1357_v27, %v1358_v51 }
 0x226   : > { %v1363_v28 = vsel %vm863_vm10, %v1355_v25, %v1356_v26  ;;  %v1366_v29 = vsel %vm385_vm8, %v1342_v22, %v1356_v26  ;;  %v2656_v32 = vsel %vm385_vm8, %v1344_v24, %v1367_v30  ;;  %v844_v34 = vpop.permute.xlu1 %843 }
 0x227   : > { %v2653_v31 = vsel %vm385_vm8, %v1340_v45, %v1363_v28  ;;  %1385 = vst [vmem:[#allocation4 + $0x188] sm:$0xf] %v1366_v29  ;;  %v842_v33 = vpop.permute.xlu0 %841 }
 0x228   : > { %v856_v37 = vrot.slane %v842_v33, 4 }
 0x22a   : > { %v864_v38 = vsel %vm863_vm10, %v855_v36, %v856_v37  ;;  %v867_v39 = vsel %vm865_vm14, %v842_v33, %v856_v37  ;;  %v1281_v42 = vpop.permute.xlu1 %1280 }
 0x22b   : > { %v2663_v40 = vsel %vm865_vm14, %v2596_v50, %v864_v38  ;;  %886 = vst [vmem:[#allocation4 + $0x8] sm:$0xf] %v867_v39  ;;  %v2665_v41 = vpop.permute.xlu0 %1353  ;;  %v1291_v44 = vrot.slane %v1281_v42, 4  ;;  %v857_v38 = vrot.slane %v844_v34, 4 }
 0x22c   : > { %v1362_v43 = vrot.slane %v2665_v41, 4 }
 0x22d   : > { %v1303_v48 = vsel %vm361_vm7, %v1281_v42, %v1291_v44 }
 0x22e   : > { %v1375_v45 = vsel %vm385_vm8, %v2665_v41, %v1362_v43  ;;  %1320 = vst [vmem:[#allocation4 + $0x170] sm:$0xf] %v1303_v48  ;;  %v1056_v50 = vpop.permute.xlu1 %1055  ;;  %v2237_v18 = vld [vmem:[#allocation4 + $0x188] ss:$12 sps:$4 sm:$0xff]  }
 0x22f   : > { %1391 = vst [vmem:[#allocation4 + $0x1ac] sm:$0xf] %v1375_v45  ;;  %v2673_v51 = vpop.permute.xlu0 %1284 }
 0x230   : > { %v1293_v52 = vrot.slane %v2673_v51, 4 }
 0x232   : > { %v1306_v56 = vsel %vm361_vm7, %v2673_v51, %v1293_v52  ;;  %v987_v58 = vpop.permute.xlu1 %986 }
 0x233   : > { %1322 = vst [vmem:[#allocation4 + $0x17c] sm:$0xf] %v1306_v56  ;;  %v1054_v57 = vpop.permute.xlu0 %1053 }
 0x234   : > { %v1066_v62 = vrot.slane %v1054_v57, 4 }
 0x236   : > { %v1075_v1 = vsel %vm863_vm10, %v1065_v61, %v1066_v62  ;;  %v1077_v2 = vsel %vm1072_vm11, %v1054_v57, %v1066_v62  ;;  %v918_v6 = vpop.permute.xlu1 %917 }
 0x237   : > { %v2685_v3 = vsel %vm1072_vm11, %v2617_v60, %v1075_v1  ;;  %1095 = vst [vmem:[#allocation4 + $0xa4] sm:$0xf] %v1077_v2  ;;  %v985_v47 = vpop.permute.xlu0 %984  ;;  %v927_v60 = vrot.slane %v2642_v16, 4  ;;  %v1067_v1 = vrot.slane %v1056_v50, 4 }
 0x238   : > { %v997_v8 = vrot.slane %v985_v47, 4 }
 0x23a   : > { %v1006_v10 = vsel %vm863_vm10, %v996_v7, %v997_v8  ;;  %v1008_v15 = vsel %vm1003_vm12, %v985_v47, %v997_v8  ;;  %v1348_v12 = vpop.permute.xlu1 %1347 }
 0x23b   : > { %v2692_v17 = vsel %vm1003_vm12, %v2634_v49, %v1006_v10  ;;  %1026 = vst [vmem:[#allocation4 + $0x74] sm:$0xf] %v1008_v15  ;;  %v916_v19 = vpop.permute.xlu0 %915  ;;  %v1359_v28 = vrot.slane %v1348_v12, 4  ;;  %v998_v15 = vrot.slane %v987_v58, 4 }
 0x23c   : > { %v928_v20 = vrot.slane %v916_v19, 4 }
 0x23e   : > { %v937_v22 = vsel %vm863_vm10, %v927_v60, %v928_v20  ;;  %v939_v24 = vsel %vm934_vm13, %v916_v19, %v928_v20  ;;  %v848_v27 = vpop.permute.xlu1 %847 }
 0x23f   : > { %v2699_v25 = vsel %vm934_vm13, %v2642_v16, %v937_v22  ;;  %957 = vst [vmem:[#allocation4 + $0x44] sm:$0xf] %v939_v24  ;;  %v1350_v26 = vpop.permute.xlu0 %1349 }
 0x240   : > { %v1360_v49 = vrot.slane %v1350_v26, 4 }
 0x242   : > { %v1370_v29 = vsel %vm863_vm10, %v1359_v28, %v1360_v49  ;;  %v1372_v30 = vsel %vm385_vm8, %v1350_v26, %v1360_v49  ;;  %v1279_v37 = vpop.permute.xlu1 %1278  ;;  %v929_v28 = vrot.slane %v918_v6, 4 }
 0x243   : > { %v2704_v33 = vsel %vm385_vm8, %v1348_v12, %v1370_v29  ;;  %1389 = vst [vmem:[#allocation4 + $0x1a0] sm:$0xf] %v1372_v30  ;;  %v846_v36 = vpop.permute.xlu0 %845  ;;  %v1290_v42 = vrot.slane %v1279_v37, 4 }
 0x244   : > { %v858_v39 = vrot.slane %v846_v36, 4 }
 0x245   : > { %v1301_v48 = vsel %vm863_vm10, %v1290_v42, %v1291_v44 }
 0x246   : > { %v868_v16 = vsel %vm863_vm10, %v857_v38, %v858_v39  ;;  %v870_v45 = vsel %vm865_vm14, %v846_v36, %v858_v39  ;;  %v2713_v57 = vsel %vm361_vm7, %v1279_v37, %v1301_v48  ;;  %v1060_v62 = vpop.permute.xlu1 %1059 }
 0x247   : > { %v2710_v56 = vsel %vm865_vm14, %v844_v34, %v868_v16  ;;  %888 = vst [vmem:[#allocation4 + $0x14] sm:$0xf] %v870_v45  ;;  %v1058_v61 = vpop.permute.xlu0 %1057 }
 0x248   : > { %v1068_v2 = vrot.slane %v1058_v61, 4 }
 0x24a   : > { %v1078_v47 = vsel %vm863_vm10, %v1067_v1, %v1068_v2  ;;  %v1080_v7 = vsel %vm1072_vm11, %v1058_v61, %v1068_v2  ;;  %v1271_v44 = vpop.permute.xlu1 %1270  ;;  %v1069_v61 = vrot.slane %v1060_v62, 4 }
 0x24b   : > { %v1079_v8 = vsel %vm1072_vm11, %v1056_v50, %v1078_v47  ;;  %1097 = vst [vmem:[#allocation4 + $0xb0] sm:$0xf] %v1080_v7  ;;  %v989_v10 = vpop.permute.xlu0 %988  ;;  %v1286_v19 = vrot.slane %v1271_v44, 4 }
 0x24c   : > { %v999_v34 = vrot.slane %v989_v10, 4 }
 0x24d   : > { %v1294_v20 = vsel %vm863_vm10, %v1286_v19, %v1287_v55 }
 0x24e   : > { %v1009_v12 = vsel %vm863_vm10, %v998_v15, %v999_v34  ;;  %v1011_v60 = vsel %vm1003_vm12, %v989_v10, %v999_v34  ;;  %v2727_v50 = vsel %vm361_vm7, %v1271_v44, %v1294_v20  ;;  %v991_v26 = vpop.permute.xlu1 %990  ;;  %v2065_v20 = vcombine.high %v2632_v4, %v2685_v3 }
 0x24f   : > { %v2724_v22 = vsel %vm1003_vm12, %v987_v58, %v1009_v12  ;;  %1028 = vst [vmem:[#allocation4 + $0x80] sm:$0xf] %v1011_v60  ;;  %v920_v24 = vpop.permute.xlu0 %919  ;;  %v859_v58 = vrot.slane %v848_v27, 4  ;;  %v1000_v53 = vrot.slane %v991_v26, 4 }
 0x250   : > { %v930_v49 = vrot.slane %v920_v24, 4 }
 0x252   : > { %v940_v29 = vsel %vm863_vm10, %v929_v28, %v930_v49  ;;  %v942_v30 = vsel %vm934_vm13, %v920_v24, %v930_v49  ;;  %v1212_v55 = vpop.permute.xlu1 %1211 }
 0x253   : > { %v2732_v36 = vsel %vm934_vm13, %v918_v6, %v940_v29  ;;  %959 = vst [vmem:[#allocation4 + $0x50] sm:$0xf] %v942_v30  ;;  %v850_v35 = vpop.permute.xlu0 %849  ;;  %v1222_v38 = vrot.slane %v1212_v55, 4 }
 0x254   : > { %v860_v37 = vrot.slane %v850_v35, 4 }
 0x255   : > { %v1234_v16 = vsel %vm1226_vm15, %v1212_v55, %v1222_v38 }
 0x256   : > { %v871_v39 = vsel %vm863_vm10, %v859_v58, %v860_v37  ;;  %v873_v42 = vsel %vm865_vm14, %v850_v35, %v860_v37  ;;  %1251 = vst [vmem:[#allocation4 + $0x140] sm:$0xf] %v1234_v16  ;;  %v2740_v48 = vpop.permute.xlu1 %921  ;;  %v2095_v35 = vcombine.high %v2653_v31, %v2656_v32 }
 0x257   : > { %v2738_v45 = vsel %vm865_vm14, %v848_v27, %v871_v39  ;;  %890 = vst [vmem:[#allocation4 + $0x20] sm:$0xf] %v873_v42  ;;  %v1062_v6 = vpop.permute.xlu0 %1061  ;;  %v2094_v42 = vcombine.low %v2653_v31, %v2656_v32 }
 0x258   : > { %v1070_v1 = vrot.slane %v1062_v6, 4 }
 0x25a   : > { %v1081_v2 = vsel %vm863_vm10, %v1069_v61, %v1070_v1  ;;  %v1083_v47 = vsel %vm1072_vm11, %v1062_v6, %v1070_v1  ;;  %v1352_v44 = vpop.permute.xlu1 %1351  ;;  %v2059_v6 = vcombine.high %v2640_v13, %v2692_v17  ;;  %v2212_v61 = vld [vmem:[#allocation4 + $0x170] ss:$12 sps:$4 sm:$0xff]   ;;  %v2785_v1 = vld [vmem:[%s2889_s3 + $0x8] ss:$12 sps:$4 sm:$0xff]  }
 0x25b   : > { %v1082_v7 = vsel %vm1072_vm11, %v1060_v62, %v1081_v2  ;;  %1099 = vst [vmem:[#allocation4 + $0xbc] sm:$0xf] %v1083_v47  ;;  %v1275_v10 = vpop.permute.xlu0 %1274  ;;  %v1361_v34 = vrot.slane %v1352_v44, 4 }
 0x25c   : > { %v1288_v15 = vrot.slane %v1275_v10, 4  ;;  %v2067_v27 = vcombine.low %v1079_v8, %v1082_v7  ;;  %v2068_v19 = vcombine.high %v1079_v8, %v1082_v7  ;;  %v2058_v7 = vcombine.low %v2640_v13, %v2692_v17 }
 0x25d   : > { %v1373_v60 = vsel %vm863_vm10, %v1361_v34, %v1362_v43  ;;  %v2064_v43 = vcombine.low %v2632_v4, %v2685_v3 }
 0x25e   : > { %v1298_v12 = vsel %vm863_vm10, %v1288_v15, %v1289_v54  ;;  %1781 = vmatprep.subr.bf16.mxu0 %v2068_v19  ;;  %v1374_v24 = vsel %vm385_vm8, %v1352_v44, %v1373_v60  ;;  %v2757_v49 = vpop.permute.xlu1 %851 }
 0x25f   : > { %v2754_v62 = vsel %vm361_vm7, %v1275_v10, %v1298_v12  ;;  %v993_v28 = vpop.permute.xlu0 %992  ;;  %1782 = vmatpush1.bf16.msra.mxu0 %v2067_v27  ;;  %v2097_v54 = vcombine.low %v2704_v33, %v1374_v24  ;;  %v2098_v41 = vcombine.high %v2704_v33, %v1374_v24  ;;  %v2215_v27 = vld [vmem:[#allocation4 + $0x158] ss:$12 sps:$4 sm:$0xff]  }
 0x260   : > { %v1001_v8 = vrot.slane %v993_v28, 4  ;;  %1783 = vmatprep.subr.bf16.mxu0 %v2065_v20 }
 0x261   : > { %1836 = vmatprep.subr.bf16.mxu1 %v2098_v41 }
 0x262   : > { %v1012_v29 = vsel %vm863_vm10, %v1000_v53, %v1001_v8  ;;  %v1014_v30 = vsel %vm1003_vm12, %v993_v28, %v1001_v8  ;;  %v1210_v37 = vpop.permute.xlu1 %1209  ;;  %1837 = vmatpush1.bf16.msra.mxu1 %v2097_v54  ;;  %v2214_v10 = vld [vmem:[#allocation4 + $0xb0] ss:$12 sps:$4 sm:$0xff]   ;;  %v2216_v28 = vld [vmem:[#allocation4 + $0x98] ss:$12 sps:$4 sm:$0xff]   ;;  %v2053_v8 = vcombine.high %v2647_v21, %v2699_v25 }
 0x263   : > { %v1013_v55 = vsel %vm1003_vm12, %v991_v26, %v1012_v29  ;;  %1030 = vst [vmem:[#allocation4 + $0x8c] sm:$0xf] %v1014_v30  ;;  %v2768_v58 = vpop.permute.xlu0 %1215  ;;  %1784 = vmatpush1.bf16.msra.mxu0 %v2064_v43  ;;  %v1221_v39 = vrot.slane %v1210_v37, 4  ;;  %1838 = vmatprep.subr.bf16.mxu1 %v2095_v35  ;;  %v2052_v35 = vcombine.low %v2647_v21, %v2699_v25 }
 0x264   : > { %v1224_v33 = vrot.slane %v2768_v58, 4  ;;  %v2061_v4 = vcombine.low %v2724_v22, %v1013_v55  ;;  %v2062_v3 = vcombine.high %v2724_v22, %v1013_v55 }
 0x265   : > { %v1232_v16 = vsel %vm863_vm10, %v1221_v39, %v1222_v38  ;;  %v931_v38 = vrot.slane %v2740_v48, 4 }
 0x266   : > { %v1237_v26 = vsel %vm1226_vm15, %v2768_v58, %v1224_v33  ;;  %1785 = vmatprep.subr.bf16.mxu0 %v2062_v3  ;;  %v2788_v31 = vsel %vm1226_vm15, %v1210_v37, %v1232_v16  ;;  %v1204_v22 = vpop.permute.xlu1 %1203  ;;  %1839 = vmatpush1.bf16.msra.mxu1 %v2094_v42 }
 0x267   : > { %1253 = vst [vmem:[#allocation4 + $0x14c] sm:$0xf] %v1237_v26  ;;  %v924_v32 = vpop.permute.xlu0 %923  ;;  %1786 = vmatpush1.bf16.msra.mxu0 %v2061_v4  ;;  %v1218_v47 = vrot.slane %v1204_v22, 4  ;;  %2121 = vmatprep.subr.bf16.mxu1 %v2212_v61 }
 0x268   : > { %v932_v2 = vrot.slane %v924_v32, 4  ;;  %1787 = vmatprep.subr.bf16.mxu0 %v2059_v6 }
 0x269   : > { %v1228_v34 = vsel %vm1226_vm15, %v1204_v22, %v1218_v47  ;;  %2100 = vmatmul.mubr.msk.bf16.vlgmr.msra.gmra.mxu1 %vm1777_vm0, %v2785_v1 }
 0x26a   : > { %v943_v44 = vsel %vm863_vm10, %v931_v38, %v932_v2  ;;  %v945_v15 = vsel %vm934_vm13, %v924_v32, %v932_v2  ;;  %1247 = vst [vmem:[#allocation4 + $0x128] sm:$0xf] %v1228_v34  ;;  %v1202_v60 = vpop.permute.xlu1 %1201  ;;  %2122 = vmatpush3.bf16.msra.mxu1 %v2214_v10  ;;  %1899 = vmatprep.mubr.bf16.mxu1 %v2624_v0  ;;  %v861_v0 = vrot.slane %v2757_v49, 4  ;;  %v2218_v55 = vld [vmem:[#allocation4 + $0x80] ss:$12 sps:$4 sm:$0xff]  }
 0x26b   : > { %v944_v19 = vsel %vm934_vm13, %v2740_v48, %v943_v44  ;;  %961 = vst [vmem:[#allocation4 + $0x5c] sm:$0xf] %v945_v15  ;;  %v1208_v12 = vpop.permute.xlu0 %1207  ;;  %1788 = vmatpush1.bf16.msra.mxu0 %v2058_v7  ;;  %v1217_v17 = vrot.slane %v1202_v60, 4  ;;  %2123 = vmatprep.subr.bf16.mxu1 %v2215_v27  ;;  %v2220_v10 = vld [vmem:[#allocation4 + $0x68] ss:$12 sps:$4 sm:$0xff]   ;;  %v2046_v15 = vcombine.low %v2663_v40, %v2710_v56 }
 0x26c   : > { %v1220_v13 = vrot.slane %v1208_v12, 4  ;;  %v2055_v20 = vcombine.low %v2732_v36, %v944_v19  ;;  %v2056_v24 = vcombine.high %v2732_v36, %v944_v19 }
 0x26d   : > { %v1225_v48 = vsel %vm863_vm10, %v1217_v17, %v1218_v47 }
 0x26e   : > { %v1231_v53 = vsel %vm1226_vm15, %v1208_v12, %v1220_v13  ;;  %1789 = vmatprep.subr.bf16.mxu0 %v2056_v24  ;;  %v2217_v54 = vld [vmem:[#allocation4 + $0x140] ss:$12 sps:$4 sm:$0xff]   ;;  %v2808_v41 = vsel %vm1226_vm15, %v1202_v60, %v1225_v48  ;;  %v1143_v29 = vpop.permute.xlu1 %1142  ;;  %2124 = vmatpush3.bf16.msra.mxu1 %v2216_v28  ;;  %v2088_v48 = vcombine.low %v2727_v50, %v2754_v62 }
 0x26f   : > { %1249 = vst [vmem:[#allocation4 + $0x134] sm:$0xf] %v1231_v53  ;;  %v854_v43 = vpop.permute.xlu0 %853  ;;  %1790 = vmatpush1.bf16.msra.mxu0 %v2055_v20  ;;  %v1153_v30 = vrot.slane %v1143_v29, 4  ;;  %2125 = vmatprep.subr.bf16.mxu1 %v2217_v54 }
 0x270   : > { %v862_v36 = vrot.slane %v854_v43, 4  ;;  %1791 = vmatprep.subr.bf16.mxu0 %v2053_v8 }
 0x271   : > { %v1165_v4 = vsel %vm302_vm9, %v1143_v29, %v1153_v30 }
 0x272   : > { %v874_v37 = vsel %vm863_vm10, %v861_v0, %v862_v36  ;;  %v876_v39 = vsel %vm865_vm14, %v854_v43, %v862_v36  ;;  %1182 = vst [vmem:[#allocation4 + $0x110] sm:$0xf] %v1165_v4  ;;  %v1141_v26 = vpop.permute.xlu1 %1140  ;;  %2126 = vmatpush3.bf16.msra.mxu1 %v2218_v55 }
 0x273   : > { %v875_v3 = vsel %vm865_vm14, %v2757_v49, %v874_v37  ;;  %892 = vst [vmem:[#allocation4 + $0x2c] sm:$0xf] %v876_v39  ;;  %v1206_v42 = vpop.permute.xlu0 %1205  ;;  %1792 = vmatpush1.bf16.msra.mxu0 %v2052_v35  ;;  %v1152_v6 = vrot.slane %v1141_v26, 4  ;;  %v2047_v49 = vcombine.high %v2663_v40, %v2710_v56 }
 0x274   : > { %v1219_v16 = vrot.slane %v1206_v42, 4  ;;  %v2049_v21 = vcombine.low %v2738_v45, %v875_v3  ;;  %v2050_v25 = vcombine.high %v2738_v45, %v875_v3 }
 0x275   : > { %v1163_v32 = vsel %vm863_vm10, %v1152_v6, %v1153_v30  ;;  %v2224_v6 = vld [vmem:[#allocation4 + $0x38] ss:$12 sps:$4 sm:$0xff]  }
 0x276   : > { %v1229_v61 = vsel %vm863_vm10, %v1219_v16, %v1220_v13  ;;  %v2219_v22 = vld [vmem:[#allocation4 + $0x128] ss:$12 sps:$4 sm:$0xff]   ;;  %1793 = vmatprep.subr.bf16.mxu0 %v2050_v25  ;;  %v2826_v2 = vsel %vm302_vm9, %v1141_v26, %v1163_v32  ;;  %v1135_v7 = vpop.permute.xlu1 %1134 }
 0x277   : > { %v1230_v38 = vsel %vm1226_vm15, %v1206_v42, %v1229_v61  ;;  %v1283_v47 = vpop.permute.xlu0 %1282  ;;  %1794 = vmatpush1.bf16.msra.mxu0 %v2049_v21  ;;  %v1149_v45 = vrot.slane %v1135_v7, 4  ;;  %2127 = vmatprep.subr.bf16.mxu1 %v2219_v22  ;;  %v2227_v32 = vld [vmem:[#allocation4 + $0xc8] ss:$12 sps:$4 sm:$0xff]  }
 0x278   : > { %v1292_v44 = vrot.slane %v1283_v47, 4  ;;  %1795 = vmatprep.subr.bf16.mxu0 %v2047_v49  ;;  %2128 = vmatpush3.bf16.msra.mxu1 %v2220_v10  ;;  %v2083_v35 = vcombine.high %v2808_v41, %v1230_v38  ;;  %v2228_v22 = vld [vmem:[#allocation4 + $0x8] ss:$12 sps:$4 sm:$0xff]   ;;  %v2231_v49 = vld [vmem:[%s2889_s3] ss:$12 sps:$4 sm:$0xff]  }
 0x279   : > { %v1159_v27 = vsel %vm302_vm9, %v1135_v7, %v1149_v45 }
 0x27a   : > { %v1304_v34 = vsel %vm863_vm10, %v1292_v44, %v1293_v52  ;;  %1178 = vst [vmem:[#allocation4 + $0xf8] sm:$0xf] %v1159_v27  ;;  %v1133_v60 = vpop.permute.xlu1 %1132  ;;  %v2089_v52 = vcombine.high %v2727_v50, %v2754_v62  ;;  %v2222_v62 = vld [vmem:[#allocation4 + $0x50] ss:$12 sps:$4 sm:$0xff]   ;;  %v2226_v61 = vld [vmem:[#allocation4 + $0x20] ss:$12 sps:$4 sm:$0xff]  }
 0x27b   : > { %v1305_v19 = vsel %vm361_vm7, %v1283_v47, %v1304_v34  ;;  %v1147_v12 = vpop.permute.xlu0 %1146  ;;  %1796 = vmatpush1.bf16.msra.mxu0 %v2046_v15  ;;  %v1148_v17 = vrot.slane %v1133_v60, 4 }
 0x27c   : > { %v1155_v13 = vrot.slane %v1147_v12, 4  ;;  %v2091_v20 = vcombine.low %v2713_v57, %v1305_v19  ;;  %v2092_v24 = vcombine.high %v2713_v57, %v1305_v19 }
 0x27d   : > { %v1156_v51 = vsel %vm863_vm10, %v1148_v17, %v1149_v45 }
 0x27e   : > { %v1168_v40 = vsel %vm302_vm9, %v1147_v12, %v1155_v13  ;;  %1797 = vmatprep.subr.bf16.mxu0 %v2092_v24  ;;  %v1158_v56 = vsel %vm302_vm9, %v1133_v60, %v1156_v51 }
 0x27f   : > { %1184 = vst [vmem:[#allocation4 + $0x11c] sm:$0xf] %v1168_v40  ;;  %v1214_v28 = vpop.permute.xlu0 %1213  ;;  %1798 = vmatpush2.bf16.msra.mxu0 %v2091_v20 }
 0x280   : > { %v1223_v53 = vrot.slane %v1214_v28, 4  ;;  %1799 = vmatprep.subr.bf16.mxu0 %v2089_v52 }
 0x282   : > { %v1235_v57 = vsel %vm863_vm10, %v1223_v53, %v1224_v33  ;;  %v2082_v33 = vcombine.low %v2808_v41, %v1230_v38  ;;  %v2225_v41 = vld [vmem:[#allocation4 + $0xe0] ss:$12 sps:$4 sm:$0xff]  }
 0x283   : > { %v1236_v8 = vsel %vm1226_vm15, %v1214_v28, %v1235_v57  ;;  %v1139_v54 = vpop.permute.xlu0 %1138  ;;  %1800 = vmatpush2.bf16.msra.mxu0 %v2088_v48  ;;  %v2234_v38 = vld [vmem:[#allocation4 + $0x1a0] ss:$12 sps:$4 sm:$0xff]  }
 0x284   : > { %v1151_v43 = vrot.slane %v1139_v54, 4  ;;  %v2085_v29 = vcombine.low %v2788_v31, %v1236_v8  ;;  %v2086_v0 = vcombine.high %v2788_v31, %v1236_v8 }
 0x286   : > { %v1162_v36 = vsel %vm302_vm9, %v1139_v54, %v1151_v43  ;;  %v2221_v30 = vld [vmem:[#allocation4 + $0x110] ss:$12 sps:$4 sm:$0xff]   ;;  %1801 = vmatprep.subr.bf16.mxu0 %v2086_v0 }
 0x287   : > { %1180 = vst [vmem:[#allocation4 + $0x104] sm:$0xf] %v1162_v36  ;;  %v1145_v50 = vpop.permute.xlu0 %1144  ;;  %1802 = vmatpush2.bf16.msra.mxu0 %v2085_v29  ;;  %2129 = vmatprep.subr.bf16.mxu1 %v2221_v30  ;;  %v1467_v5 = vpop.permute.xlu1 %1466 }
 0x288   : > { %v1154_v58 = vrot.slane %v1145_v50, 4  ;;  %1803 = vmatprep.subr.bf16.mxu0 %v2083_v35  ;;  %2130 = vmatpush3.bf16.msra.mxu1 %v2222_v62 }
 0x28a   : > { %v1166_v55 = vsel %vm863_vm10, %v1154_v58, %v1155_v13 }
 0x28b   : > { %v1167_v31 = vsel %vm302_vm9, %v1145_v50, %v1166_v55  ;;  %v1137_v37 = vpop.permute.xlu0 %1136  ;;  %1804 = vmatpush2.bf16.msra.mxu0 %v2082_v33 }
 0x28c   : > { %v1150_v39 = vrot.slane %v1137_v37, 4  ;;  %v2079_v4 = vcombine.low %v2826_v2, %v1167_v31  ;;  %v2080_v3 = vcombine.high %v2826_v2, %v1167_v31 }
 0x28e   : > { %v1160_v42 = vsel %vm863_vm10, %v1150_v39, %v1151_v43  ;;  %v2223_v26 = vld [vmem:[#allocation4 + $0xf8] ss:$12 sps:$4 sm:$0xff]   ;;  %1805 = vmatprep.subr.bf16.mxu0 %v2080_v3 }
 0x28f   : > { %v1161_v16 = vsel %vm302_vm9, %v1137_v37, %v1160_v42  ;;  %1806 = vmatpush2.bf16.msra.mxu0 %v2079_v4  ;;  %2131 = vmatprep.subr.bf16.mxu1 %v2223_v26 }
 0x290   : > { %v2076_v21 = vcombine.low %v1158_v56, %v1161_v16  ;;  %v2077_v25 = vcombine.high %v1158_v56, %v1161_v16  ;;  %2132 = vmatpush3.bf16.msra.mxu1 %v2224_v6 }
 0x291   : > { %2133 = vmatprep.subr.bf16.mxu1 %v2225_v41 }
 0x292   : > { %1807 = vmatprep.subr.bf16.mxu0 %v2077_v25 }
 0x293   : > { %1808 = vmatpush2.bf16.msra.mxu0 %v2076_v21 }
 0x294   : > { %1809 = vmatprep.subr.bf16.mxu0 %v2074_v63  ;;  %2134 = vmatpush3.bf16.msra.mxu1 %v2226_v61 }
 0x295   : > { %2135 = vmatprep.subr.bf16.mxu1 %v2227_v32 }
 0x297   : > { %1810 = vmatpush2.bf16.msra.mxu0 %v2073_v14 }
 0x298   : > { %1811 = vmatprep.subr.bf16.mxu0 %v2071_v11  ;;  %2136 = vmatpush3.bf16.msra.mxu1 %v2228_v22 }
 0x299   : > { %2160 = vmatprep.subr.bf16.mxu1 %v2254_v46 }
 0x29b   : > { %1812 = vmatpush2.bf16.msra.mxu0 %v2070_v9  ;;  %1900 = vmatmul.mubr.bf16.vlgmr.msra.gmra.mxu1 %v2231_v49 }
 0x29c   : > { %2161 = vmatpush3.bf16.msra.mxu1 %v2234_v38  ;;  %2164 = vmatprep.mubr.msk.bf16.mxu1 %vm2261_vm1, %v2254_v46 }
 0x29d   : > { %2162 = vmatprep.subr.bf16.mxu1 %v2254_v46  ;;  %v1472_v46 = vpop.permute.xlu0 %1471 }
 0x29e   : > { %1814 = vmatmul.mubr.bf16.vlgmr.msra.gmra.mxu0 %v2231_v49 }
 0x2a0   : > { %2163 = vmatpush3.bf16.msra.mxu1 %v2237_v18 }
 0x2a3   : > { %2165 = vmatmul.mubr.msk.bf16.vlgmr.msra.gmra.mxu1 %vm1777_vm0, %v2785_v1 }
 0x329   : > { %v1858_v11 = vpop.f32.mrf.mxu1 }
 0x32b   : > { %v1860_v23 = vpop.f32.mrf.mxu1 }
 0x32d   : > { %v1862_v14 = vpop.f32.mrf.mxu1 }
 0x32f   : > { %v1864_v63 = vpop.f32.mrf.mxu1 }
 0x35b   : > { %v2137_v59 = vpop.f32.mrf.mxu1 }
 0x35d   : > { %v2138_v9 = vpop.f32.mrf.mxu1 }
 0x35e   : > { %v1815_v2 = vpop.f32.mrf.mxu0  ;;  %v2139_v47 = vadd.f32 %v2138_v9, %v2137_v59 }
 0x35f   : > { %v1816_v7 = vadd.f32 %v1815_v2, %v1467_v5  ;;  %v2140_v10 = vpop.f32.mrf.mxu1 }
 0x360   : > { %v1817_v44 = vpop.f32.mrf.mxu0  ;;  %v1902_v1 = vadd.f32 %v2139_v47, %v1467_v5 }
 0x361   : > { %v1859_v45 = vadd.f32 %v1858_v11, %v1816_v7  ;;  %v1818_v15 = vadd.f32 %v1817_v44, %v1467_v5  ;;  %v2141_v34 = vpop.f32.mrf.mxu1 }
 0x362   : > { %v1819_v27 = vpop.f32.mrf.mxu0  ;;  %v2142_v19 = vadd.f32 %v2141_v34, %v2140_v10 }
 0x363   : > { %v1949_v12 = vmax.f32 %v1859_v45, 0.0  ;;  %v1861_v60 = vadd.f32 %v1860_v23, %v1818_v15  ;;  %v1820_v13 = vadd.f32 %v1819_v27, %v1472_v46  ;;  %v1942_v17 = vpop.f32.mrf.mxu1 }
 0x364   : > { %v1821_v20 = vpop.f32.mrf.mxu0  ;;  %v1943_v24 = vadd.f32 %v1942_v17, %v1902_v1  ;;  %v1905_v53 = vadd.f32 %v2142_v19, %v1472_v46 }
 0x365   : > { %1955 = vst [vmem:[%s251_s27] sm:$0xff] %v1949_v12  ;;  %v1950_v40 = vmax.f32 %v1861_v60, 0.0  ;;  %v1863_v51 = vadd.f32 %v1862_v14, %v1820_v13  ;;  %v2166_v52 = vpop.f32.mrf.mxu1  ;;  %v1822_v56 = vadd.f32 %v1821_v20, %v1472_v46 }
 0x366   : > { %v1951_v28 = vmax.f32 %v1943_v24, 0.0 }
 0x367   : > { %1956 = vst [vmem:[%s251_s27 + $0x8] sm:$0xff] %v1950_v40  ;;  %v1952_v48 = vmax.f32 %v1863_v51, 0.0  ;;  %v1945_v57 = vpop.f32.mrf.mxu1  ;;  %v1865_v8 = vadd.f32 %v1864_v63, %v1822_v56 }
 0x368   : > { %1957 = vst [vmem:[%s251_s27 + $0x10] sm:$0xff] %v1951_v28  ;;  %v1946_v54 = vadd.f32 %v1945_v57, %v1905_v53 }
 0x369   : > { %1958 = vst [vmem:[%s251_s27 + $0x18] sm:$0xff] %v1952_v48  ;;  %v2167_v43 = vpop.f32.mrf.mxu1  ;;  %v1953_v29 = vmax.f32 %v1865_v8, 0.0 }
 0x36a   : > { %v1954_v0 = vmax.f32 %v1946_v54, 0.0 }
 0x36b   : > { %1959 = vst [vmem:[%s251_s27 + $0x20] sm:$0xff] %v1953_v29 }
 0x36c   : > { %1960 = vst [vmem:[%s251_s27 + $0x28] sm:$0xff] %v1954_v0 }
 0x36d PF: > { %s16_s21 = sadd.s32 1, %s2244_s21  }
 0x36e   : > { %p13_p4 = scmp.ge.s32.totalorder %s16_s21, 4  }
 0x370   :  { %15 = sbr.rel (!%p13_p4) target bundleno = 1 (0x1), region = 74 }

</bundles_post_ra>
